<compile_context>
chip_gen: v5e
topology: v5e:2x2
jax: 0.10.0
libtpu: 0.0.40
codegen_flags: <defaults>
</compile_context>

<pallas_src>
import functools

import jax
import jax.numpy as jnp
from jax import lax
from jax.experimental import pallas as pl
from jax.experimental.pallas import tpu as pltpu


def _contrastive_loss_kernel(s_ref, t_ref, o_ref,
                             s_bf_ref, m_ref, l_ref,
                             *, inv_temp, b_valid, block, need_col_mask):
    i = pl.program_id(0)          # student row block    (parallel)
    j = pl.program_id(1)          # teacher column block (arbitrary / streamed)
    nj = pl.num_programs(1)

    eps_sq = jnp.float32(1e-24)   # (PyTorch F.normalize eps = 1e-12) ** 2

    # ---- once per row block: normalize student rows, fold in 1/temperature,
    #      cast to bf16 for the MXU, reset the online-logsumexp state. --------
    @pl.when(j == 0)
    def _init():
        s = s_ref[...].astype(jnp.float32)
        ssq = jnp.sum(s * s, axis=1, keepdims=True)
        inv = lax.rsqrt(jnp.maximum(ssq, eps_sq)) * jnp.float32(inv_temp)
        s_bf_ref[...] = (s * inv).astype(jnp.bfloat16)
        m_ref[...] = jnp.full(m_ref.shape, -jnp.inf, dtype=jnp.float32)
        l_ref[...] = jnp.zeros(l_ref.shape, dtype=jnp.float32)

    # ---- normalize the streamed teacher column block (f32 math, bf16 to MXU).
    t = t_ref[...].astype(jnp.float32)
    tsq = jnp.sum(t * t, axis=1, keepdims=True)
    t_bf = (t * lax.rsqrt(jnp.maximum(tsq, eps_sq))).astype(jnp.bfloat16)

    s_bf = s_bf_ref[...]

    # ---- (TM, TN) logits tile on the MXU, f32 accumulation (1/T pre-folded).
    sim = lax.dot_general(
        s_bf, t_bf,
        dimension_numbers=(((1,), (1,)), ((), ())),
        preferred_element_type=jnp.float32,
    )

    if need_col_mask:
        # Padded teacher columns (global col >= b_valid) must not contribute
        # to the logsumexp: mask them to -inf.
        col = j * block + lax.broadcasted_iota(jnp.int32, (1, block), 1)
        sim = jnp.where(col < b_valid, sim, jnp.float32(-jnp.inf))

    # ---- online logsumexp update over column blocks. -------------------------
    m_prev = m_ref[...]
    m_new = jnp.maximum(m_prev, jnp.max(sim, axis=1, keepdims=True))
    alpha = jnp.exp(m_prev - m_new)
    l_ref[...] = alpha * l_ref[...] + jnp.sum(jnp.exp(sim - m_new), axis=1,
                                              keepdims=True)
    m_ref[...] = m_new

    # ---- the diagonal logits live in column block j == i: compute them as a
    #      row-wise dot (TM*D VPU work, once per row block) and stash them in
    #      the resident output block (read back at finalize). -----------------
    @pl.when(j == i)
    def _diag():
        o_ref[...] = jnp.sum(
            s_bf.astype(jnp.float32) * t_bf.astype(jnp.float32),
            axis=1, keepdims=True)

    # ---- finalize: per-row loss term = logsumexp - diagonal logit. -----------
    @pl.when(j == nj - 1)
    def _fin():
        o_ref[...] = m_ref[...] + jnp.log(l_ref[...]) - o_ref[...]


def contrastive_loss(teacher_features, student_features, temperature=0.05,
                     block=128):
    b, d = teacher_features.shape
    assert student_features.shape == (b, d)

    b_pad = -(-b // block) * block
    d_pad = -(-d // 128) * 128
    num_blk = b_pad // block

    def pad(x):
        return jnp.pad(x.astype(jnp.float32),
                       ((0, b_pad - b), (0, d_pad - d)))

    s_p = pad(student_features)   # zero-padding does not change norms / dots
    t_p = pad(teacher_features)

    kernel = functools.partial(
        _contrastive_loss_kernel,
        inv_temp=1.0 / float(temperature),
        b_valid=b,
        block=block,
        need_col_mask=(b_pad != b),
    )

    cost = pl.CostEstimate(
        flops=2 * b_pad * b_pad * d_pad + 8 * b_pad * d_pad,
        transcendentals=b_pad * b_pad + 2 * b_pad,
        bytes_accessed=2 * b_pad * d_pad * 4 + b_pad * 4,
    )

    per_row = pl.pallas_call(
        kernel,
        out_shape=jax.ShapeDtypeStruct((b_pad, 1), jnp.float32),
        grid_spec=pltpu.PrefetchScalarGridSpec(
            num_scalar_prefetch=0,
            grid=(num_blk, num_blk),
            in_specs=[
                pl.BlockSpec((block, d_pad), lambda i, j: (i, 0)),  # student
                pl.BlockSpec((block, d_pad), lambda i, j: (j, 0)),  # teacher
            ],
            out_specs=pl.BlockSpec((block, 1), lambda i, j: (i, 0)),
            scratch_shapes=[
                pltpu.VMEM((block, d_pad), jnp.bfloat16),  # scaled student (1/T folded)
                pltpu.VMEM((block, 1), jnp.float32),       # running max
                pltpu.VMEM((block, 1), jnp.float32),       # running sum
            ],
        ),
        compiler_params=pltpu.CompilerParams(
            dimension_semantics=("parallel", "arbitrary"),
            vmem_limit_bytes=48 * 1024 * 1024,
        ),
        cost_estimate=cost,
    )(s_p, t_p)

    # Padded student rows are excluded from the mean (cross_entropy mean
    # reduction is over the true batch only).
    return jnp.mean(per_row[:b, 0])


def _reference_loss(teacher, student, temperature=0.05):
    # Pure-JAX f32 reference mirroring the PyTorch module.
    def norm(x):
        n = jnp.sqrt(jnp.sum(x * x, axis=1, keepdims=True))
        return x / jnp.maximum(n, 1e-12)

    t = norm(teacher.astype(jnp.float32))
    s = norm(student.astype(jnp.float32))
    sim = (s @ t.T) / temperature
    logz = jax.scipy.special.logsumexp(sim, axis=1)
    idx = jnp.arange(sim.shape[0])
    return jnp.mean(logz - sim[idx, idx])


if __name__ == "__main__":
    key = jax.random.PRNGKey(0)

    # Small shapes consistent with the module: (batch, feature).  The second
    # case exercises a multi-block grid plus ragged-row/column masking.
    test_cases = [(8, 32), (200, 96)]
    ok = True
    for B, D in test_cases:
        k_t, k_s, key = jax.random.split(key, 3)
        teacher = jax.random.normal(k_t, (B, D), dtype=jnp.float32)
        student = jax.random.normal(k_s, (B, D), dtype=jnp.float32)

        loss = contrastive_loss(teacher, student, temperature=0.05)
        loss = jax.block_until_ready(loss)

        ref = _reference_loss(teacher, student, temperature=0.05)
        # bf16 MXU operands (f32 accumulation) -> slightly loose tolerance.
        if not jnp.allclose(loss, ref, atol=2e-2, rtol=2e-2):
            ok = False
            print("MISMATCH", (B, D), float(loss), float(ref))

    if ok:
        print("KERNEL_OK")
</pallas_src>

<mosaic_0001>
module attributes {stable_mosaic.version = 11 : i64} {
  func.func @_contrastive_loss_kernel(%arg0: i32, %arg1: i32, %arg2: memref<128x128xf32, #tpu.memory_space<vmem>>, %arg3: memref<128x128xf32, #tpu.memory_space<vmem>>, %arg4: memref<128x1xf32, #tpu.memory_space<vmem>>, %arg5: memref<128x128xbf16, #tpu.memory_space<vmem>>, %arg6: memref<128x1xf32, #tpu.memory_space<vmem>>, %arg7: memref<128x1xf32, #tpu.memory_space<vmem>>) attributes {dimension_semantics = [#tpu.dimension_semantics<parallel>, #tpu.dimension_semantics<arbitrary>], iteration_bounds = array<i64: 1, 1>, scalar_prefetch = 0 : i64, scratch_operands = 3 : i64, tpu.core_type = #tpu.core_type<tc>, window_params = [{transform_indices = @transform_0, window_bounds = array<i64: 128, 128>}, {transform_indices = @transform_1, window_bounds = array<i64: 128, 128>}, {transform_indices = @transform_2, window_bounds = array<i64: 128, 1>}]} {
    %c0_i32 = arith.constant 0 : i32
    %0 = arith.cmpi eq, %arg1, %c0_i32 : i32
    %1 = arith.extui %0 : i1 to i32
    %cst = arith.constant 1.000000e-24 : f32
    %c0_i32_0 = arith.constant 0 : i32
    %2 = arith.cmpi ne, %1, %c0_i32_0 : i32
    scf.if %2 {
      %c0_21 = arith.constant 0 : index
      %c0_22 = arith.constant 0 : index
      %47 = vector.load %arg2[%c0_21, %c0_22] : memref<128x128xf32, #tpu.memory_space<vmem>>, vector<128x128xf32>
      %48 = arith.mulf %47, %47 : vector<128x128xf32>
      %cst_23 = arith.constant dense<0.000000e+00> : vector<128xf32>
      %49 = vector.multi_reduction <add>, %48, %cst_23 [1] : vector<128x128xf32> to vector<128xf32>
      %50 = vector.shape_cast %49 : vector<128xf32> to vector<128x1xf32>
      %51 = vector.broadcast %cst : f32 to vector<128x1xf32>
      %52 = arith.maximumf %50, %51 : vector<128x1xf32>
      %53 = math.rsqrt %52 : vector<128x1xf32>
      %cst_24 = arith.constant 2.000000e+01 : f32
      %54 = vector.broadcast %cst_24 : f32 to vector<128x1xf32>
      %55 = arith.mulf %53, %54 : vector<128x1xf32>
      %56 = vector.broadcast %55 : vector<128x1xf32> to vector<128x128xf32>
      %57 = arith.mulf %47, %56 : vector<128x128xf32>
      %58 = arith.truncf %57 : vector<128x128xf32> to vector<128x128xbf16>
      %c0_25 = arith.constant 0 : index
      %c0_26 = arith.constant 0 : index
      %59 = vector.load %arg5[%c0_25, %c0_26] : memref<128x128xbf16, #tpu.memory_space<vmem>>, vector<128x128xbf16>
      tpu.vector_store %arg5[%c0_25, %c0_26], %58 {strides = array<i32>} : memref<128x128xbf16, #tpu.memory_space<vmem>>, vector<128x128xbf16>,
      %cst_27 = arith.constant 0xFF800000 : f32
      %60 = vector.broadcast %cst_27 : f32 to vector<128x1xf32>
      %c0_28 = arith.constant 0 : index
      %c0_29 = arith.constant 0 : index
      %61 = vector.load %arg6[%c0_28, %c0_29] : memref<128x1xf32, #tpu.memory_space<vmem>>, vector<128x1xf32>
      tpu.vector_store %arg6[%c0_28, %c0_29], %60 {strides = array<i32>} : memref<128x1xf32, #tpu.memory_space<vmem>>, vector<128x1xf32>,
      %cst_30 = arith.constant 0.000000e+00 : f32
      %62 = vector.broadcast %cst_30 : f32 to vector<128x1xf32>
      %c0_31 = arith.constant 0 : index
      %c0_32 = arith.constant 0 : index
      %63 = vector.load %arg7[%c0_31, %c0_32] : memref<128x1xf32, #tpu.memory_space<vmem>>, vector<128x1xf32>
      tpu.vector_store %arg7[%c0_31, %c0_32], %62 {strides = array<i32>} : memref<128x1xf32, #tpu.memory_space<vmem>>, vector<128x1xf32>,
    } else {
    }
    %c0 = arith.constant 0 : index
    %c0_1 = arith.constant 0 : index
    %3 = vector.load %arg3[%c0, %c0_1] : memref<128x128xf32, #tpu.memory_space<vmem>>, vector<128x128xf32>
    %4 = arith.mulf %3, %3 : vector<128x128xf32>
    %cst_2 = arith.constant dense<0.000000e+00> : vector<128xf32>
    %5 = vector.multi_reduction <add>, %4, %cst_2 [1] : vector<128x128xf32> to vector<128xf32>
    %6 = vector.shape_cast %5 : vector<128xf32> to vector<128x1xf32>
    %cst_3 = arith.constant 1.000000e-24 : f32
    %7 = vector.broadcast %cst_3 : f32 to vector<128x1xf32>
    %8 = arith.maximumf %6, %7 : vector<128x1xf32>
    %9 = math.rsqrt %8 : vector<128x1xf32>
    %10 = vector.broadcast %9 : vector<128x1xf32> to vector<128x128xf32>
    %11 = arith.mulf %3, %10 : vector<128x128xf32>
    %12 = arith.truncf %11 : vector<128x128xf32> to vector<128x128xbf16>
    %c0_4 = arith.constant 0 : index
    %c0_5 = arith.constant 0 : index
    %13 = vector.load %arg5[%c0_4, %c0_5] : memref<128x128xbf16, #tpu.memory_space<vmem>>, vector<128x128xbf16>
    %cst_6 = arith.constant dense<0.000000e+00> : vector<128x128xf32>
    %14 = tpu.matmul %13, %12, %cst_6 {dimension_numbers = #tpu.dot_dimension_numbers<[1], [1], [0], [0], [0, 0, 1, 0], [], []>} : vector<128x128xbf16>, vector<128x128xbf16>, vector<128x128xf32> -> vector<128x128xf32>
    %c128_i32 = arith.constant 128 : i32
    %15 = arith.muli %arg1, %c128_i32 : i32
    %16 = tpu.iota {dimensions = array<i32: 1>} : vector<1x128xi32>
    %17 = vector.broadcast %15 : i32 to vector<1x128xi32>
    %18 = arith.addi %17, %16 : vector<1x128xi32>
    %c8_i32 = arith.constant 8 : i32
    %19 = vector.broadcast %c8_i32 : i32 to vector<1x128xi32>
    %20 = arith.cmpi slt, %18, %19 : vector<1x128xi32>
    %cst_7 = arith.constant 0xFF800000 : f32
    %21 = vector.shape_cast %20 : vector<1x128xi1> to vector<1x128xi1>
    %22 = vector.broadcast %21 : vector<1x128xi1> to vector<128x128xi1>
    %23 = vector.broadcast %cst_7 : f32 to vector<128x128xf32>
    %24 = arith.select %22, %14, %23 : vector<128x128xi1>, vector<128x128xf32>
    %c0_8 = arith.constant 0 : index
    %c0_9 = arith.constant 0 : index
    %25 = vector.load %arg6[%c0_8, %c0_9] : memref<128x1xf32, #tpu.memory_space<vmem>>, vector<128x1xf32>
    %cst_10 = arith.constant dense<0xFF800000> : vector<128xf32>
    %26 = vector.multi_reduction <maximumf>, %24, %cst_10 [1] : vector<128x128xf32> to vector<128xf32>
    %27 = vector.shape_cast %26 : vector<128xf32> to vector<128x1xf32>
    %28 = arith.maximumf %25, %27 : vector<128x1xf32>
    %29 = arith.subf %25, %28 : vector<128x1xf32>
    %30 = math.exp %29 : vector<128x1xf32>
    %c0_11 = arith.constant 0 : index
    %c0_12 = arith.constant 0 : index
    %31 = vector.load %arg7[%c0_11, %c0_12] : memref<128x1xf32, #tpu.memory_space<vmem>>, vector<128x1xf32>
    %32 = arith.mulf %30, %31 : vector<128x1xf32>
    %33 = vector.broadcast %28 : vector<128x1xf32> to vector<128x128xf32>
    %34 = arith.subf %24, %33 : vector<128x128xf32>
    %35 = math.exp %34 : vector<128x128xf32>
    %cst_13 = arith.constant dense<0.000000e+00> : vector<128xf32>
    %36 = vector.multi_reduction <add>, %35, %cst_13 [1] : vector<128x128xf32> to vector<128xf32>
    %37 = vector.shape_cast %36 : vector<128xf32> to vector<128x1xf32>
    %38 = arith.addf %32, %37 : vector<128x1xf32>
    %c0_14 = arith.constant 0 : index
    %c0_15 = arith.constant 0 : index
    %39 = vector.load %arg7[%c0_14, %c0_15] : memref<128x1xf32, #tpu.memory_space<vmem>>, vector<128x1xf32>
    tpu.vector_store %arg7[%c0_14, %c0_15], %38 {strides = array<i32>} : memref<128x1xf32, #tpu.memory_space<vmem>>, vector<128x1xf32>,
    %c0_16 = arith.constant 0 : index
    %c0_17 = arith.constant 0 : index
    %40 = vector.load %arg6[%c0_16, %c0_17] : memref<128x1xf32, #tpu.memory_space<vmem>>, vector<128x1xf32>
    tpu.vector_store %arg6[%c0_16, %c0_17], %28 {strides = array<i32>} : memref<128x1xf32, #tpu.memory_space<vmem>>, vector<128x1xf32>,
    %41 = arith.cmpi eq, %arg1, %arg0 : i32
    %42 = arith.extui %41 : i1 to i32
    %c0_i32_18 = arith.constant 0 : i32
    %43 = arith.cmpi ne, %42, %c0_i32_18 : i32
    scf.if %43 {
      %47 = arith.extf %13 : vector<128x128xbf16> to vector<128x128xf32>
      %48 = arith.extf %12 : vector<128x128xbf16> to vector<128x128xf32>
      %49 = arith.mulf %47, %48 : vector<128x128xf32>
      %cst_21 = arith.constant dense<0.000000e+00> : vector<128xf32>
      %50 = vector.multi_reduction <add>, %49, %cst_21 [1] : vector<128x128xf32> to vector<128xf32>
      %51 = vector.shape_cast %50 : vector<128xf32> to vector<128x1xf32>
      %c0_22 = arith.constant 0 : index
      %c0_23 = arith.constant 0 : index
      %52 = vector.load %arg4[%c0_22, %c0_23] : memref<128x1xf32, #tpu.memory_space<vmem>>, vector<128x1xf32>
      tpu.vector_store %arg4[%c0_22, %c0_23], %51 {strides = array<i32>} : memref<128x1xf32, #tpu.memory_space<vmem>>, vector<128x1xf32>,
    } else {
    }
    %c0_i32_19 = arith.constant 0 : i32
    %44 = arith.cmpi eq, %arg1, %c0_i32_19 : i32
    %45 = arith.extui %44 : i1 to i32
    %c0_i32_20 = arith.constant 0 : i32
    %46 = arith.cmpi ne, %45, %c0_i32_20 : i32
    scf.if %46 {
      %c0_21 = arith.constant 0 : index
      %c0_22 = arith.constant 0 : index
      %47 = vector.load %arg6[%c0_21, %c0_22] : memref<128x1xf32, #tpu.memory_space<vmem>>, vector<128x1xf32>
      %c0_23 = arith.constant 0 : index
      %c0_24 = arith.constant 0 : index
      %48 = vector.load %arg7[%c0_23, %c0_24] : memref<128x1xf32, #tpu.memory_space<vmem>>, vector<128x1xf32>
      %49 = math.log %48 : vector<128x1xf32>
      %50 = arith.addf %47, %49 : vector<128x1xf32>
      %c0_25 = arith.constant 0 : index
      %c0_26 = arith.constant 0 : index
      %51 = vector.load %arg4[%c0_25, %c0_26] : memref<128x1xf32, #tpu.memory_space<vmem>>, vector<128x1xf32>
      %52 = arith.subf %50, %51 : vector<128x1xf32>
      %c0_27 = arith.constant 0 : index
      %c0_28 = arith.constant 0 : index
      %53 = vector.load %arg4[%c0_27, %c0_28] : memref<128x1xf32, #tpu.memory_space<vmem>>, vector<128x1xf32>
      tpu.vector_store %arg4[%c0_27, %c0_28], %52 {strides = array<i32>} : memref<128x1xf32, #tpu.memory_space<vmem>>, vector<128x1xf32>,
    } else {
    }
    return
  }
  func.func @transform_0(%arg0: i32, %arg1: i32) -> (i32, i32) {
    %c0_i32 = arith.constant 0 : i32
    %c0_i32_0 = arith.constant 0 : i32
    return %arg0, %c0_i32 : i32, i32
  }
  func.func @transform_1(%arg0: i32, %arg1: i32) -> (i32, i32) {
    %c0_i32 = arith.constant 0 : i32
    %c0_i32_0 = arith.constant 0 : i32
    return %arg1, %c0_i32 : i32, i32
  }
  func.func @transform_2(%arg0: i32, %arg1: i32) -> (i32, i32) {
    %c0_i32 = arith.constant 0 : i32
    %c0_i32_0 = arith.constant 0 : i32
    return %arg0, %c0_i32 : i32, i32
  }
}

</mosaic_0001>

<bundles_post_ra>
// kernel: tpu_custom_call.1
= control target key start
LH: loop header
LB: loop body
LE: loop exit
PB: predicated region body
PF: predicated region fallthrough
CT: control target
= control target key end

     0   :  { %7 = vsyncpa [#allocation6], 0  ;;  %s3139_s0 = inlined_call_operand.hbm [shape: f32[128,128], index: 0, kind: input, shape index: {}]   ;;  %s3140_s1 = inlined_call_operand.hbm [shape: f32[128,128], index: 1, kind: input, shape index: {}]   ;;  %s3141_s2 = inlined_call_operand.vmem [shape: f32[128,1], index: 2, kind: output, shape index: {}]  }
   0x1   :  { %s13_s11 = sshll.u32 %s3139_s0, 4  ;;  %s14_s11 = int_to_ptr.hbm [resolvable:$true] %s13_s11 }
   0x2   :  { %8 = vsyncpa [#allocation8], 0  ;;  %s1772_s12 = smov [#allocation5]   ;;  %s26_s16 = sshll.u32 %s3140_s1, 4  ;;  %s27_s16 = int_to_ptr.hbm [resolvable:$true] %s26_s16 }
   0x3   :  { %s15_s13 = sshll.u32 %s1772_s12, 4  ;;  %s1773_s17 = smov 128   ;;  %s16_s13 = int_to_ptr.vmem [resolvable:$true] %s15_s13 }
   0x4   :  { %s1774_s18 = smov 8   ;;  %s1775_s19 = smov [#allocation7]  }
   0x5   :  { %21 = dma.hbm_to_vmem [thread:$0]  %s14_s11, 2048, %s16_s13, [#allocation6], %s1773_s17, %s1773_s17, %s1774_s18  }
   0x6   :  { %s28_s20 = sshll.u32 %s1775_s19, 4  ;;  %s29_s20 = int_to_ptr.vmem [resolvable:$true] %s28_s20 }
   0x7   :  { %34 = dma.hbm_to_vmem [thread:$0]  %s27_s16, 2048, %s29_s20, [#allocation8], %s1773_s17, %s1773_s17, %s1774_s18  }
   0x8   :  { %1768 = dma.done.wait [#allocation6], 2048  }
   0x9   :  { %1769 = vsyncadd [#allocation6], 4294965248 }
   0xa   :  { %1770 = dma.done.wait [#allocation8], 2048  }
   0xb   :  { %1771 = vsyncadd [#allocation8], 4294965248  ;;  %v1800_v0 = vld [vmem:[#allocation7 + $0x70] sm:$0xff]  ;;  %v1802_v1 = vld [vmem:[#allocation7 + $0x60] sm:$0xff] }
   0xc   :  { %v1804_v2 = vld [vmem:[#allocation7 + $0x50] sm:$0xff]  ;;  %v414_v3 = vmul.f32 %v1800_v0, %v1800_v0  ;;  %v412_v4 = vmul.f32 %v1802_v1, %v1802_v1  ;;  %v1812_v6 = vld [vmem:[#allocation7 + $0x78] sm:$0xff]  ;;  %v1814_v7 = vld [vmem:[#allocation7 + $0x68] sm:$0xff] }
   0xd   :  { %v410_v5 = vmul.f32 %v1804_v2, %v1804_v2  ;;  %v1816_v8 = vld [vmem:[#allocation7 + $0x58] sm:$0xff]  ;;  %v415_v9 = vmul.f32 %v1812_v6, %v1812_v6  ;;  %v413_v10 = vmul.f32 %v1814_v7, %v1814_v7  ;;  %v1824_v12 = vld [vmem:[#allocation7 + $0x48] sm:$0xff]  ;;  %v1826_v13 = vld [vmem:[#allocation7 + $0x40] sm:$0xff] }
   0xe   :  { %444 = vadd.xlane.f32.xlu0 %v414_v3  ;;  %440 = vadd.xlane.f32.xlu1 %v412_v4  ;;  %v411_v11 = vmul.f32 %v1816_v8, %v1816_v8  ;;  %v1828_v14 = vld [vmem:[#allocation7 + $0x30] sm:$0xff]  ;;  %v409_v15 = vmul.f32 %v1824_v12, %v1824_v12  ;;  %v408_v16 = vmul.f32 %v1826_v13, %v1826_v13  ;;  %v1836_v18 = vld [vmem:[#allocation7 + $0x38] sm:$0xff]  ;;  %v1838_v19 = vld [vmem:[#allocation7 + $0x20] sm:$0xff] }
   0xf   :  { %436 = vadd.xlane.f32.xlu2 %v410_v5  ;;  %v406_v17 = vmul.f32 %v1828_v14, %v1828_v14  ;;  %v1840_v20 = vld [vmem:[#allocation7 + $0x28] sm:$0xff]  ;;  %v407_v21 = vmul.f32 %v1836_v18, %v1836_v18  ;;  %v404_v22 = vmul.f32 %v1838_v19, %v1838_v19  ;;  %v1848_v24 = vld [vmem:[#allocation7 + $0x18] sm:$0xff]  ;;  %v1850_v25 = vld [vmem:[#allocation7 + $0x10] sm:$0xff] }
  0x10   :  { %v405_v23 = vmul.f32 %v1840_v20, %v1840_v20  ;;  %v1852_v26 = vld [vmem:[#allocation5 + $0x40] sm:$0xff]  ;;  %v403_v27 = vmul.f32 %v1848_v24, %v1848_v24  ;;  %v402_v28 = vmul.f32 %v1850_v25, %v1850_v25  ;;  %v1862_v31 = vld [vmem:[#allocation5 + $0x48] sm:$0xff]  ;;  %v58_v48 = vld [vmem:[#allocation5 + $0x58] sm:$0xff] }
  0x11   :  { %v71_v29 = vmul.f32 %v1852_v26, %v1852_v26  ;;  %v1860_v30 = vld [vmem:[#allocation5 + $0x60] sm:$0xff]  ;;  %v1864_v32 = vld [vmem:[#allocation5 + $0x68] sm:$0xff]  ;;  %v72_v34 = vmul.f32 %v1862_v31, %v1862_v31  ;;  %v57_v49 = vld [vmem:[#allocation5 + $0x50] sm:$0xff]  ;;  %v74_v51 = vmul.f32 %v58_v48, %v58_v48 }
  0x12   :  { %v75_v33 = vmul.f32 %v1860_v30, %v1860_v30  ;;  %v76_v35 = vmul.f32 %v1864_v32, %v1864_v32  ;;  %v1872_v36 = vld [vmem:[#allocation7 + $0x8] sm:$0xff]  ;;  %v1874_v37 = vld [vmem:[#allocation7] sm:$0xff]  ;;  %v61_v50 = vld [vmem:[#allocation5 + $0x70] sm:$0xff]  ;;  %v73_v52 = vmul.f32 %v57_v49, %v57_v49 }
  0x13   :  { %v1876_v38 = vld [vmem:[#allocation5] sm:$0xff]  ;;  %v401_v39 = vmul.f32 %v1872_v36, %v1872_v36  ;;  %v400_v40 = vmul.f32 %v1874_v37, %v1874_v37  ;;  %v1886_v43 = vld [vmem:[#allocation5 + $0x8] sm:$0xff]  ;;  %v77_v53 = vmul.f32 %v61_v50, %v61_v50  ;;  %v49_v54 = vld [vmem:[#allocation5 + $0x10] sm:$0xff] }
  0x14   :  { %v63_v41 = vmul.f32 %v1876_v38, %v1876_v38  ;;  %v1884_v42 = vld [vmem:[#allocation5 + $0x20] sm:$0xff]  ;;  %v1888_v44 = vld [vmem:[#allocation5 + $0x28] sm:$0xff]  ;;  %v64_v46 = vmul.f32 %v1886_v43, %v1886_v43  ;;  %v62_v55 = vld [vmem:[#allocation5 + $0x78] sm:$0xff]  ;;  %v65_v57 = vmul.f32 %v49_v54, %v49_v54 }
  0x15   :  { %v67_v45 = vmul.f32 %v1884_v42, %v1884_v42  ;;  %v68_v47 = vmul.f32 %v1888_v44, %v1888_v44  ;;  %v50_v56 = vld [vmem:[#allocation5 + $0x18] sm:$0xff]  ;;  %v78_v58 = vmul.f32 %v62_v55, %v62_v55  ;;  %v53_v61 = vld [vmem:[#allocation5 + $0x30] sm:$0xff] }
  0x16   :  { %446 = vadd.xlane.f32.xlu0 %v415_v9  ;;  %442 = vadd.xlane.f32.xlu1 %v413_v10  ;;  %v66_v59 = vmul.f32 %v50_v56, %v50_v56  ;;  %v54_v60 = vld [vmem:[#allocation5 + $0x38] sm:$0xff]  ;;  %v69_v63 = vmul.f32 %v53_v61, %v53_v61 }
  0x17   :  { %438 = vadd.xlane.f32.xlu2 %v411_v11  ;;  %v70_v62 = vmul.f32 %v54_v60, %v54_v60 }
  0x1e   :  { %434 = vadd.xlane.f32.xlu1 %v409_v15  ;;  %432 = vadd.xlane.f32.xlu0 %v408_v16 }
  0x1f   :  { %428 = vadd.xlane.f32.xlu2 %v406_v17 }
  0x26   :  { %430 = vadd.xlane.f32.xlu0 %v407_v21  ;;  %424 = vadd.xlane.f32.xlu1 %v404_v22 }
  0x27   :  { %426 = vadd.xlane.f32.xlu2 %v405_v23 }
  0x2e   :  { %422 = vadd.xlane.f32.xlu1 %v403_v27  ;;  %420 = vadd.xlane.f32.xlu0 %v402_v28 }
  0x2f   :  { %95 = vadd.xlane.f32.xlu2 %v71_v29 }
  0x36   :  { %103 = vadd.xlane.f32.xlu1 %v75_v33  ;;  %97 = vadd.xlane.f32.xlu0 %v72_v34 }
  0x37   :  { %105 = vadd.xlane.f32.xlu2 %v76_v35 }
  0x3e   :  { %418 = vadd.xlane.f32.xlu1 %v401_v39  ;;  %416 = vadd.xlane.f32.xlu0 %v400_v40 }
  0x3f   :  { %79 = vadd.xlane.f32.xlu2 %v63_v41 }
  0x46   :  { %87 = vadd.xlane.f32.xlu1 %v67_v45  ;;  %81 = vadd.xlane.f32.xlu0 %v64_v46 }
  0x47   :  { %89 = vadd.xlane.f32.xlu2 %v68_v47 }
  0x4e   :  { %101 = vadd.xlane.f32.xlu1 %v74_v51  ;;  %99 = vadd.xlane.f32.xlu0 %v73_v52 }
  0x4f   :  { %107 = vadd.xlane.f32.xlu2 %v77_v53 }
  0x56   :  { %83 = vadd.xlane.f32.xlu1 %v65_v57  ;;  %109 = vadd.xlane.f32.xlu0 %v78_v58 }
  0x57   :  { %85 = vadd.xlane.f32.xlu2 %v66_v59 }
  0x5e   :  { %93 = vadd.xlane.f32.xlu1 %v70_v62  ;;  %91 = vadd.xlane.f32.xlu0 %v69_v63 }
  0x81   :  { %v445_v3 = vpop.xlane.xlu0 %444  ;;  %v441_v4 = vpop.xlane.xlu1 %440 }
  0x82   :  { %v462_v5 = vmax.f32 %v445_v3, 1e-24  ;;  %v460_v9 = vmax.f32 %v441_v4, 1e-24  ;;  %v437_v10 = vpop.xlane.xlu2 %436 }
  0x83   :  { %v458_v11 = vmax.f32 %v437_v10, 1e-24 }
  0x84   :  { %1552 = vrsqrt.f32 %v462_v5  ;;  %vm610_vm0 = vweird.f32 %v462_v5  ;;  %vm590_vm1 = vweird.f32 %v460_v9 }
  0x85   :  { %1554 = vrsqrt.f32 %v460_v9  ;;  %vm570_vm3 = vweird.f32 %v458_v11 }
  0x86   :  { %1556 = vrsqrt.f32 %v458_v11 }
  0x89   :  { %v447_v15 = vpop.xlane.xlu0 %446  ;;  %v443_v16 = vpop.xlane.xlu1 %442 }
  0x8a   :  { %v1896_v17 = vpop.eup %1552  ;;  %v1898_v21 = vmax.f32 %v447_v15, 1e-24  ;;  %v1900_v22 = vmax.f32 %v443_v16, 1e-24  ;;  %v439_v23 = vpop.xlane.xlu2 %438 }
  0x8b   :  { %v1902_v27 = vpop.eup %1554  ;;  %v605_v28 = vmul.f32 %v1896_v17, %v462_v5  ;;  %v1905_v29 = vmax.f32 %v439_v23, 1e-24  ;;  %vm611_vm2 = vweird.f32 %v1896_v17 }
  0x8c   :  { %v1907_v33 = vpop.eup %1556  ;;  %v585_v34 = vmul.f32 %v1902_v27, %v460_v9  ;;  %1558 = vrsqrt.f32 %v1898_v21  ;;  %vm591_vm4 = vweird.f32 %v1902_v27  ;;  %vm1944_vm6 = vmor %vm610_vm0, %vm611_vm2  ;;  %vm620_vm7 = vweird.f32 %v1898_v21 }
  0x8d   :  { %v606_v35 = vmul.f32 %v1896_v17, %v605_v28  ;;  %v565_v39 = vmul.f32 %v1907_v33, %v458_v11  ;;  %1560 = vrsqrt.f32 %v1900_v22  ;;  %vm571_vm5 = vweird.f32 %v1907_v33  ;;  %vm1957_vm9 = vmor %vm590_vm1, %vm591_vm4 }
  0x8e   :  { %v586_v40 = vmul.f32 %v1902_v27, %v585_v34  ;;  %1562 = vrsqrt.f32 %v1905_v29  ;;  %vm600_vm8 = vweird.f32 %v1900_v22  ;;  %vm580_vm10 = vweird.f32 %v1905_v29  ;;  %vm1969_vm11 = vmor %vm570_vm3, %vm571_vm5 }
  0x8f   :  { %v607_v41 = vmul.f32 0.5, %v606_v35  ;;  %v566_v45 = vmul.f32 %v1907_v33, %v565_v39 }
  0x90   :  { %v587_v46 = vmul.f32 0.5, %v586_v40 }
  0x91   :  { %v608_v47 = vsub.f32 1.5, %v607_v41  ;;  %v567_v48 = vmul.f32 0.5, %v566_v45  ;;  %v435_v49 = vpop.xlane.xlu1 %434  ;;  %v433_v50 = vpop.xlane.xlu0 %432 }
  0x92   :  { %v1917_v51 = vpop.eup %1558  ;;  %v588_v52 = vsub.f32 1.5, %v587_v46  ;;  %v1920_v53 = vmax.f32 %v435_v49, 1e-24  ;;  %v429_v54 = vpop.xlane.xlu2 %428  ;;  %v1939_v4 = vmax.f32 %v433_v50, 1e-24 }
  0x93   :  { %v1922_v55 = vpop.eup %1560  ;;  %v609_v56 = vmul.f32 %v1896_v17, %v608_v47  ;;  %v568_v57 = vsub.f32 1.5, %v567_v48  ;;  %v615_v58 = vmul.f32 %v1917_v51, %v1898_v21  ;;  %vm621_vm12 = vweird.f32 %v1917_v51 }
  0x94   :  { %v1928_v59 = vpop.eup %1562  ;;  %v589_v60 = vmul.f32 %v1902_v27, %v588_v52  ;;  %v595_v61 = vmul.f32 %v1922_v55, %v1900_v22  ;;  %1564 = vrsqrt.f32 %v1920_v53  ;;  %vm601_vm13 = vweird.f32 %v1922_v55  ;;  %vm1994_vm15 = vmor %vm620_vm7, %vm621_vm12 }
  0x95   :  { %v569_v62 = vmul.f32 %v1907_v33, %v568_v57  ;;  %v616_v63 = vmul.f32 %v1917_v51, %v615_v58  ;;  %v575_v3 = vmul.f32 %v1928_v59, %v1905_v29  ;;  %v613_v16 = vsel %vm1944_vm6, %v1896_v17, %v609_v56  ;;  %vm2009_vm0 = vmor %vm600_vm8, %vm601_vm13 }
  0x96   :  { %v596_v15 = vmul.f32 %v1922_v55, %v595_v61  ;;  %v593_v34 = vsel %vm1957_vm9, %v1902_v27, %v589_v60  ;;  %1566 = vrsqrt.f32 %v1939_v4  ;;  %v638_v45 = vmul.f32 %v613_v16, %v1800_v0 }
  0x97   :  { %v617_v5 = vmul.f32 0.5, %v616_v63  ;;  %v576_v28 = vmul.f32 %v1928_v59, %v575_v3  ;;  %v573_v35 = vsel %vm1969_vm11, %v1907_v33, %v569_v62  ;;  %vm581_vm14 = vweird.f32 %v1928_v59 }
  0x98   :  { %v597_v9 = vmul.f32 0.5, %v596_v15  ;;  %v1983_v47 = vmax.f32 %v429_v54, 1e-24  ;;  %v636_v49 = vmul.f32 %v593_v34, %v1802_v1  ;;  %v634_v56 = vmul.f32 %v573_v35, %v1804_v2  ;;  %vm2026_vm1 = vmor %vm580_vm10, %vm581_vm14 }
  0x99   :  { %v618_v39 = vsub.f32 1.5, %v617_v5  ;;  %v577_v40 = vmul.f32 0.5, %v576_v28  ;;  %v431_v27 = vpop.xlane.xlu0 %430  ;;  %v425_v41 = vpop.xlane.xlu1 %424  ;;  %v2017_v61 = vpack.c.bf16 %v638_v45, %v638_v45  ;;  %vm560_vm2 = vweird.f32 %v1920_v53 }
  0x9a   :  { %v1979_v11 = vpop.eup %1564  ;;  %v598_v46 = vsub.f32 1.5, %v597_v9  ;;  %v427_v48 = vpop.xlane.xlu2 %426  ;;  %1568 = vrsqrt.f32 %v1983_v47  ;;  %v2000_v1 = vmax.f32 %v431_v27, 1e-24  ;;  %v2034_v63 = vpack.c.bf16 %v636_v49, %v636_v49 }
  0x9b   :  { %v619_v33 = vmul.f32 %v1917_v51, %v618_v39  ;;  %v578_v50 = vsub.f32 1.5, %v577_v40  ;;  %v555_v52 = vmul.f32 %v1979_v11, %v1920_v53  ;;  %v2015_v60 = vmax.f32 %v427_v48, 1e-24 }
  0x9c   :  { %v599_v54 = vmul.f32 %v1922_v55, %v598_v46  ;;  %1570 = vrsqrt.f32 %v2000_v1  ;;  %v2032_v62 = vpop.eup %1566  ;;  %v2040_v29 = vpack.c.bf16 %v634_v56, %v634_v56  ;;  %vm550_vm3 = vweird.f32 %v1939_v4 }
  0x9d   :  { %v623_v57 = vsel %vm1994_vm15, %v1917_v51, %v619_v33  ;;  %v579_v21 = vmul.f32 %v1928_v59, %v578_v50  ;;  %v556_v58 = vmul.f32 %v1979_v11, %v555_v52  ;;  %1572 = vrsqrt.f32 %v2015_v60 }
  0x9e   :  { %v603_v51 = vsel %vm2009_vm0, %v1922_v55, %v599_v54  ;;  %v639_v10 = vmul.f32 %v623_v57, %v1812_v6  ;;  %v545_v15 = vmul.f32 %v2032_v62, %v1939_v4  ;;  %vm561_vm4 = vweird.f32 %v1979_v11 }
  0x9f   :  { %v583_v55 = vsel %vm2026_vm1, %v1928_v59, %v579_v21  ;;  %v557_v3 = vmul.f32 0.5, %v556_v58  ;;  %v637_v16 = vmul.f32 %v603_v51, %v1814_v7  ;;  %v2048_v5 = vmax.f32 %v425_v41, 1e-24  ;;  %vm2083_vm8 = vmor %vm560_vm2, %vm561_vm4 }
  0xa0   :  { %v2050_v34 = vpop.eup %1568  ;;  %v635_v17 = vmul.f32 %v583_v55, %v1816_v8  ;;  %v546_v6 = vmul.f32 %v2032_v62, %v545_v15  ;;  %vm530_vm5 = vweird.f32 %v1983_v47  ;;  %v2065_v41 = vpack.c.bf16 %v639_v10, %v639_v10 }
  0xa1   :  { %v558_v23 = vsub.f32 1.5, %v557_v3  ;;  %v423_v59 = vpop.xlane.xlu1 %422  ;;  %v421_v28 = vpop.xlane.xlu0 %420  ;;  %v525_v39 = vmul.f32 %v2050_v34, %v1983_v47  ;;  %1574 = vrsqrt.f32 %v2048_v5  ;;  %vm540_vm6 = vweird.f32 %v2000_v1 }
  0xa2   :  { %v2055_v9 = vmax.f32 %v423_v59, 1e-24  ;;  %v96_v35 = vpop.xlane.xlu2 %95  ;;  %v2061_v40 = vmax.f32 %v421_v28, 1e-24  ;;  %v2063_v27 = vpop.eup %1570  ;;  %v547_v8 = vmul.f32 0.5, %v546_v6  ;;  %v2071_v46 = vpack.c.bf16 %v637_v16, %v637_v16 }
  0xa3   :  { %v559_v7 = vmul.f32 %v1979_v11, %v558_v23  ;;  %v2069_v45 = vpop.eup %1572  ;;  %vm551_vm7 = vweird.f32 %v2032_v62  ;;  %v526_v48 = vmul.f32 %v2050_v34, %v525_v39  ;;  %v535_v49 = vmul.f32 %v2063_v27, %v2000_v1 }
  0xa4   :  { %1576 = vrsqrt.f32 %v2055_v9  ;;  %v2077_v33 = vpack.c.bf16 %v635_v17, %v635_v17  ;;  %v548_v52 = vsub.f32 1.5, %v547_v8  ;;  %vm531_vm9 = vweird.f32 %v2050_v34  ;;  %vm2107_vm12 = vmor %vm550_vm3, %vm551_vm7 }
  0xa5   :  { %v515_v56 = vmul.f32 %v2069_v45, %v2015_v60  ;;  %v563_v0 = vsel %vm2083_vm8, %v1979_v11, %v559_v7  ;;  %v527_v54 = vmul.f32 0.5, %v526_v48  ;;  %v536_v57 = vmul.f32 %v2063_v27, %v535_v49  ;;  %vm2134_vm0 = vmor %vm530_vm5, %vm531_vm9 }
  0xa6   :  { %vm520_vm10 = vweird.f32 %v2015_v60  ;;  %1578 = vrsqrt.f32 %v2061_v40  ;;  %v549_v53 = vmul.f32 %v2032_v62, %v548_v52  ;;  %vm510_vm11 = vweird.f32 %v2048_v5 }
  0xa7   :  { %v516_v2 = vmul.f32 %v2069_v45, %v515_v56  ;;  %v2099_v21 = vmax.f32 %v96_v35, 1e-24  ;;  %v2101_v58 = vpop.eup %1574  ;;  %v528_v51 = vsub.f32 1.5, %v527_v54  ;;  %v537_v22 = vmul.f32 0.5, %v536_v57 }
  0xa8   :  { %vm541_vm13 = vweird.f32 %v2063_v27  ;;  %vm500_vm14 = vweird.f32 %v2055_v9  ;;  %v633_v15 = vmul.f32 %v563_v0, %v1824_v12  ;;  %v553_v4 = vsel %vm2107_vm12, %v2032_v62, %v549_v53 }
  0xa9   :  { %v104_v55 = vpop.xlane.xlu1 %103  ;;  %v98_v3 = vpop.xlane.xlu0 %97  ;;  %v517_v16 = vmul.f32 0.5, %v516_v2  ;;  %v505_v23 = vmul.f32 %v2101_v58, %v2048_v5  ;;  %v529_v59 = vmul.f32 %v2050_v34, %v528_v51  ;;  %v538_v28 = vsub.f32 1.5, %v537_v22  ;;  %vm2151_vm2 = vmor %vm540_vm6, %vm541_vm13 }
  0xaa   :  { %v2113_v10 = vpop.eup %1576  ;;  %vm521_vm15 = vweird.f32 %v2069_v45  ;;  %v106_v6 = vpop.xlane.xlu2 %105  ;;  %v632_v35 = vmul.f32 %v553_v4, %v1826_v13  ;;  %1580 = vrsqrt.f32 %v2099_v21  ;;  %vm490_vm1 = vweird.f32 %v2061_v40 }
  0xab   :  { %v495_v17 = vmul.f32 %v2113_v10, %v2055_v9  ;;  %v518_v12 = vsub.f32 1.5, %v517_v16  ;;  %v506_v7 = vmul.f32 %v2101_v58, %v505_v23  ;;  %v539_v8 = vmul.f32 %v2063_v27, %v538_v28  ;;  %vm2175_vm5 = vmor %vm520_vm10, %vm521_vm15 }
  0xac   :  { %v2128_v62 = vpop.eup %1578  ;;  %v751_v13 = vunpack.c.l.b16 %v2065_v41  ;;  %v2142_v49 = vpack.c.bf16 %v633_v15, %v633_v15  ;;  %v533_v50 = vsel %vm2134_vm0, %v2050_v34, %v529_v59  ;;  %v750_v34 = vunpack.c.l.b16 %v2017_v61 }
  0xad   :  { %v496_v48 = vmul.f32 %v2113_v10, %v495_v17  ;;  %v507_v52 = vmul.f32 0.5, %v506_v7  ;;  %v485_v56 = vmul.f32 %v2128_v62, %v2061_v40  ;;  %v543_v0 = vsel %vm2151_vm2, %v2063_v27, %v539_v8 }
  0xae   :  { %v519_v54 = vmul.f32 %v2069_v45, %v518_v12  ;;  %v2162_v53 = vpack.c.bf16 %v632_v35, %v632_v35  ;;  %vm511_vm3 = vweird.f32 %v2101_v58  ;;  %vm501_vm4 = vweird.f32 %v2113_v10 }
  0xaf   :  { %v497_v57 = vmul.f32 0.5, %v496_v48  ;;  %v508_v1 = vsub.f32 1.5, %v507_v52  ;;  %v630_v2 = vmul.f32 %v533_v50, %v1828_v14  ;;  %v486_v51 = vmul.f32 %v2128_v62, %v485_v56  ;;  %vm2189_vm6 = vmor %vm510_vm11, %vm511_vm3 }
  0xb0   :  { %v759_v22 = vpack.c.b16 %v751_v13, %v750_v34  ;;  %v2168_v15 = vpop.eup %1580  ;;  %v631_v27 = vmul.f32 %v543_v0, %v1836_v18  ;;  %v2180_v23 = vmax.f32 %v104_v55, 1e-24  ;;  %v2182_v14 = vmax.f32 %v98_v3, 1e-24  ;;  %vm2203_vm7 = vmor %vm500_vm14, %vm501_vm4 }
  0xb1   :  { %v498_v11 = vsub.f32 1.5, %v497_v57  ;;  %v509_v16 = vmul.f32 %v2101_v58, %v508_v1  ;;  %v523_v59 = vsel %vm2175_vm5, %v2069_v45, %v519_v54  ;;  %v487_v28 = vmul.f32 0.5, %v486_v51  ;;  %v419_v55 = vpop.xlane.xlu1 %418  ;;  %v417_v3 = vpop.xlane.xlu0 %416 }
  0xb2   :  { %v208_v17 = vmul.f32 %v2168_v15, %v2099_v21  ;;  %768 = vmatpush.bf16.xpose.msra.mxu0 %v759_v22  ;;  %1518 = vmatpush.bf16.xpose.msra.mxu1 %v759_v22  ;;  %vm491_vm8 = vweird.f32 %v2128_v62  ;;  %vm213_vm9 = vweird.f32 %v2099_v21  ;;  %1582 = vrsqrt.f32 %v2180_v23  ;;  %v80_v7 = vpop.xlane.xlu2 %79 }
  0xb3   :  { %v499_v60 = vmul.f32 %v2113_v10, %v498_v11  ;;  %v513_v45 = vsel %vm2189_vm6, %v2101_v58, %v509_v16  ;;  %1519 = vmatpush.bf16.xpose.msra.mxu2 %v759_v22  ;;  %1520 = vmatpush.bf16.xpose.msra.mxu3 %v759_v22  ;;  %v2210_v35 = vpack.c.bf16 %v630_v2, %v630_v2  ;;  %v488_v12 = vsub.f32 1.5, %v487_v28  ;;  %vm492_vm11 = vmor %vm490_vm1, %vm491_vm8 }
  0xb4   :  { %v209_v9 = vmul.f32 %v2168_v15, %v208_v17  ;;  %v2216_v39 = vpack.c.bf16 %v631_v27, %v631_v27  ;;  %v629_v8 = vmul.f32 %v523_v59, %v1840_v20  ;;  %1584 = vrsqrt.f32 %v2182_v14 }
  0xb5   :  { %v503_v58 = vsel %vm2203_vm7, %v2113_v10, %v499_v60  ;;  %v2220_v48 = vmax.f32 %v106_v6, 1e-24  ;;  %v628_v13 = vmul.f32 %v513_v45, %v1838_v19  ;;  %v489_v50 = vmul.f32 %v2128_v62, %v488_v12 }
  0xb6   :  { %v210_v47 = vmul.f32 0.5, %v209_v9  ;;  %vm214_vm10 = vweird.f32 %v2168_v15  ;;  %v627_v10 = vmul.f32 %v503_v58, %v1848_v24  ;;  %v748_v20 = vunpack.c.l.b16 %v2034_v63 }
  0xb7   :  { %1586 = vrsqrt.f32 %v2220_v48  ;;  %v749_v6 = vunpack.c.l.b16 %v2071_v46  ;;  %v493_v19 = vsel %vm492_vm11, %v2128_v62, %v489_v50  ;;  %v2234_v56 = vmax.f32 %v419_v55, 1e-24  ;;  %vm2260_vm13 = vmor %vm213_vm9, %vm214_vm10 }
  0xb8   :  { %v211_v52 = vsub.f32 1.5, %v210_v47  ;;  %v2236_v0 = vmax.f32 %v417_v3, 1e-24  ;;  %v2238_v54 = vpop.eup %1582  ;;  %v2240_v24 = vpack.c.bf16 %v629_v8, %v629_v8  ;;  %vm253_vm12 = vweird.f32 %v2180_v23 }
  0xb9   :  { %v758_v40 = vpack.c.b16 %v749_v6, %v748_v20  ;;  %v2243_v57 = vmax.f32 %v80_v7, 1e-24  ;;  %v626_v34 = vmul.f32 %v493_v19, %v1850_v25  ;;  %v248_v62 = vmul.f32 %v2238_v54, %v2180_v23  ;;  %v88_v21 = vpop.xlane.xlu1 %87  ;;  %v82_v16 = vpop.xlane.xlu0 %81 }
  0xba   :  { %v212_v1 = vmul.f32 %v2168_v15, %v211_v52  ;;  %1588 = vrsqrt.f32 %v2234_v56  ;;  %v2250_v2 = vpop.eup %1584  ;;  %v2252_v11 = vpack.c.bf16 %v628_v13, %v628_v13  ;;  %v2254_v51 = vpack.c.bf16 %v627_v10, %v627_v10  ;;  %v90_v3 = vpop.xlane.xlu2 %89 }
  0xbb   :  { %vm223_vm14 = vweird.f32 %v2182_v14  ;;  %769 = vmatpush.bf16.xpose.msra.mxu0 %v758_v40  ;;  %1521 = vmatpush.bf16.xpose.msra.mxu1 %v758_v40  ;;  %1590 = vrsqrt.f32 %v2236_v0  ;;  %v249_v27 = vmul.f32 %v2238_v54, %v248_v62  ;;  %v218_v4 = vmul.f32 %v2250_v2, %v2182_v14 }
  0xbc   :  { %v216_v25 = vsel %vm2260_vm13, %v2168_v15, %v212_v1  ;;  %vm263_vm15 = vweird.f32 %v2220_v48  ;;  %1522 = vmatpush.bf16.xpose.msra.mxu2 %v758_v40  ;;  %1523 = vmatpush.bf16.xpose.msra.mxu3 %v758_v40  ;;  %vm254_vm0 = vweird.f32 %v2238_v54  ;;  %1592 = vrsqrt.f32 %v2243_v57 }
  0xbd   :  { %v2273_v59 = vpop.eup %1586  ;;  %v746_v18 = vunpack.c.l.b16 %v2040_v29  ;;  %v747_v15 = vunpack.c.l.b16 %v2077_v33  ;;  %v2279_v60 = vpack.c.bf16 %v626_v34, %v626_v34  ;;  %v250_v28 = vmul.f32 0.5, %v249_v27  ;;  %vm255_vm4 = vmor %vm253_vm12, %vm254_vm0 }
  0xbe   :  { %v219_v17 = vmul.f32 %v2250_v2, %v218_v4  ;;  %v258_v55 = vmul.f32 %v2273_v59, %v2220_v48  ;;  %v295_v45 = vmul.f32 20.0, %v216_v25  ;;  %vm480_vm1 = vweird.f32 %v2234_v56 }
  0xbf   :  { %v2285_v5 = vmax.f32 %v88_v21, 1e-24  ;;  %v2287_v58 = vmax.f32 %v82_v16, 1e-24  ;;  %v251_v9 = vsub.f32 1.5, %v250_v28  ;;  %vm224_vm2 = vweird.f32 %v2250_v2 }
  0xc0   :  { %v2289_v12 = vpop.eup %1588  ;;  %v220_v7 = vmul.f32 0.5, %v219_v17  ;;  %v259_v8 = vmul.f32 %v2273_v59, %v258_v55  ;;  %vm470_vm3 = vweird.f32 %v2236_v0  ;;  %v757_v47 = vpack.c.b16 %v747_v15, %v746_v18  ;;  %vm225_vm7 = vmor %vm223_vm14, %vm224_vm2 }
  0xc1   :  { %v2294_v13 = vpop.eup %1590  ;;  %v475_v50 = vmul.f32 %v2289_v12, %v2234_v56  ;;  %1594 = vrsqrt.f32 %v2285_v5  ;;  %v2299_v10 = vmax.f32 %v90_v3, 1e-24  ;;  %v252_v20 = vmul.f32 %v2238_v54, %v251_v9  ;;  %v102_v18 = vpop.xlane.xlu1 %101 }
  0xc2   :  { %v221_v6 = vsub.f32 1.5, %v220_v7  ;;  %v260_v19 = vmul.f32 0.5, %v259_v8  ;;  %v465_v52 = vmul.f32 %v2294_v13, %v2236_v0  ;;  %v2304_v40 = vpop.eup %1592  ;;  %v311_v34 = vmul.f32 %v295_v45, %v1852_v26 }
  0xc3   :  { %vm264_vm5 = vweird.f32 %v2273_v59  ;;  %v476_v1 = vmul.f32 %v2289_v12, %v475_v50  ;;  %vm133_vm6 = vweird.f32 %v2243_v57  ;;  %770 = vmatpush.bf16.xpose.msra.mxu0 %v757_v47  ;;  %1524 = vmatpush.bf16.xpose.msra.mxu1 %v757_v47  ;;  %1596 = vrsqrt.f32 %v2287_v58 }
  0xc4   :  { %v256_v62 = vsel %vm255_vm4, %v2238_v54, %v252_v20  ;;  %v222_v22 = vmul.f32 %v2250_v2, %v221_v6  ;;  %v261_v26 = vsub.f32 1.5, %v260_v19  ;;  %v466_v25 = vmul.f32 %v2294_v13, %v465_v52  ;;  %1525 = vmatpush.bf16.xpose.msra.mxu2 %v757_v47  ;;  %1526 = vmatpush.bf16.xpose.msra.mxu3 %v757_v47  ;;  %vm265_vm9 = vmor %vm263_vm15, %vm264_vm5  ;;  %v108_v6 = vpop.xlane.xlu2 %107 }
  0xc5   :  { %v299_v23 = vmul.f32 20.0, %v256_v62  ;;  %v477_v27 = vmul.f32 0.5, %v476_v1  ;;  %vm481_vm8 = vweird.f32 %v2289_v12  ;;  %v128_v4 = vmul.f32 %v2304_v40, %v2243_v57 }
  0xc6   :  { %v226_v54 = vsel %vm225_vm7, %v2250_v2, %v222_v22  ;;  %v262_v21 = vmul.f32 %v2273_v59, %v261_v26  ;;  %v467_v16 = vmul.f32 0.5, %v466_v25  ;;  %1598 = vrsqrt.f32 %v2299_v10  ;;  %v100_v2 = vpop.xlane.xlu0 %99  ;;  %vm2346_vm11 = vmor %vm480_vm1, %vm481_vm8 }
  0xc7   :  { %v2328_v15 = vpop.eup %1594  ;;  %v296_v28 = vmul.f32 20.0, %v226_v54  ;;  %v478_v14 = vsub.f32 1.5, %v477_v27  ;;  %vm471_vm10 = vweird.f32 %v2294_v13  ;;  %v129_v17 = vmul.f32 %v2304_v40, %v128_v4 }
  0xc8   :  { %v315_v55 = vmul.f32 %v299_v23, %v1860_v30  ;;  %v266_v3 = vsel %vm265_vm9, %v2273_v59, %v262_v21  ;;  %v468_v45 = vsub.f32 1.5, %v467_v16  ;;  %v168_v9 = vmul.f32 %v2328_v15, %v2285_v5  ;;  %vm2359_vm13 = vmor %vm470_vm3, %vm471_vm10 }
  0xc9   :  { %v1597_v7 = vpop.eup %1596  ;;  %v312_v8 = vmul.f32 %v296_v28, %v1862_v31  ;;  %v300_v50 = vmul.f32 20.0, %v266_v3  ;;  %v479_v48 = vmul.f32 %v2289_v12, %v478_v14  ;;  %v130_v47 = vmul.f32 0.5, %v129_v17  ;;  %v84_v17 = vpop.xlane.xlu1 %83 }
  0xca   :  { %v469_v30 = vmul.f32 %v2294_v13, %v468_v45  ;;  %v169_v59 = vmul.f32 %v2328_v15, %v168_v9  ;;  %vm173_vm12 = vweird.f32 %v2285_v5  ;;  %v138_v31 = vmul.f32 %v1597_v7, %v2287_v58 }
  0xcb   :  { %v1494_v19 = vpack.c.bf16 %v312_v8, %v311_v34  ;;  %v316_v52 = vmul.f32 %v300_v50, %v1864_v32  ;;  %v131_v1 = vsub.f32 1.5, %v130_v47  ;;  %vm134_vm14 = vweird.f32 %v2304_v40 }
  0xcc   :  { %v2364_v62 = vpop.eup %1598  ;;  %v483_v22 = vsel %vm2346_vm11, %v2289_v12, %v479_v48  ;;  %v473_v32 = vsel %vm2359_vm13, %v2294_v13, %v469_v30  ;;  %v170_v34 = vmul.f32 0.5, %v169_v59  ;;  %v139_v26 = vmul.f32 %v1597_v7, %v138_v31  ;;  %vm2378_vm0 = vmor %vm133_vm6, %vm134_vm14 }
  0xcd   :  { %1514 = vst [vmem:[#allocation2 + $0x20] sm:$0xff] %v1494_v19   ;;  %v1504_v0 = vpack.c.bf16 %v316_v52, %v315_v55  ;;  %v132_v25 = vmul.f32 %v2304_v40, %v131_v1  ;;  %vm143_vm15 = vweird.f32 %v2287_v58  ;;  %v178_v23 = vmul.f32 %v2364_v62, %v2299_v10 }
  0xce   :  { %v171_v12 = vsub.f32 1.5, %v170_v34  ;;  %vm174_vm1 = vweird.f32 %v2328_v15  ;;  %v140_v13 = vmul.f32 0.5, %v139_v26  ;;  %vm144_vm2 = vweird.f32 %v1597_v7  ;;  %v110_v45 = vpop.xlane.xlu0 %109 }
  0xcf   :  { %1516 = vst [vmem:[#allocation2 + $0x30] sm:$0xff] %v1504_v0   ;;  %v625_v4 = vmul.f32 %v483_v22, %v1872_v36  ;;  %v624_v54 = vmul.f32 %v473_v32, %v1874_v37  ;;  %v136_v21 = vsel %vm2378_vm0, %v2304_v40, %v132_v25  ;;  %v179_v57 = vmul.f32 %v2364_v62, %v178_v23  ;;  %vm2394_vm4 = vmor %vm173_vm12, %vm174_vm1 }
  0xd0   :  { %v172_v16 = vmul.f32 %v2328_v15, %v171_v12  ;;  %v141_v28 = vsub.f32 1.5, %v140_v13  ;;  %vm183_vm3 = vweird.f32 %v2299_v10  ;;  %v744_v14 = vunpack.c.l.b16 %v2162_v53  ;;  %vm145_vm5 = vmor %vm143_vm15, %vm144_vm2 }
  0xd1   :  { %v180_v37 = vmul.f32 0.5, %v179_v57  ;;  %v745_v55 = vunpack.c.l.b16 %v2142_v49  ;;  %v2399_v40 = vmax.f32 %v102_v18, 1e-24  ;;  %v2401_v3 = vmax.f32 %v100_v2, 1e-24  ;;  %v94_v0 = vpop.xlane.xlu1 %93 }
  0xd2   :  { %v287_v9 = vmul.f32 20.0, %v136_v21  ;;  %v176_v8 = vsel %vm2394_vm4, %v2328_v15, %v172_v16  ;;  %v142_v50 = vmul.f32 %v1597_v7, %v141_v28  ;;  %v2406_v48 = vmax.f32 %v108_v6, 1e-24  ;;  %v86_v15 = vpop.xlane.xlu2 %85 }
  0xd3   :  { %v181_v5 = vsub.f32 1.5, %v180_v37  ;;  %vm184_vm6 = vweird.f32 %v2364_v62  ;;  %v756_v18 = vpack.c.b16 %v745_v55, %v744_v14  ;;  %1600 = vrsqrt.f32 %v2399_v40 }
  0xd4   :  { %v2413_v2 = vpack.c.bf16 %v625_v4, %v625_v4  ;;  %v291_v47 = vmul.f32 20.0, %v176_v8  ;;  %v146_v20 = vsel %vm145_vm5, %v1597_v7, %v142_v50  ;;  %1602 = vrsqrt.f32 %v2401_v3  ;;  %vm185_vm7 = vmor %vm183_vm3, %vm184_vm6 }
  0xd5   :  { %v2416_v30 = vpack.c.bf16 %v624_v54, %v624_v54  ;;  %v288_v59 = vmul.f32 20.0, %v146_v20  ;;  %v182_v31 = vmul.f32 %v2364_v62, %v181_v5  ;;  %771 = vmatpush.bf16.xpose.msra.mxu0 %v756_v18  ;;  %1527 = vmatpush.bf16.xpose.msra.mxu1 %v756_v18  ;;  %1604 = vrsqrt.f32 %v2406_v48 }
  0xd6   :  { %v303_v58 = vmul.f32 %v287_v9, %v1876_v38  ;;  %1528 = vmatpush.bf16.xpose.msra.mxu2 %v756_v18  ;;  %1529 = vmatpush.bf16.xpose.msra.mxu3 %v756_v18  ;;  %vm243_vm8 = vweird.f32 %v2399_v40  ;;  %v743_v7 = vunpack.c.l.b16 %v2216_v39  ;;  %v2427_v6 = vmax.f32 %v84_v17, 1e-24 }
  0xd7   :  { %v304_v19 = vmul.f32 %v288_v59, %v1886_v43  ;;  %v186_v52 = vsel %vm185_vm7, %v2364_v62, %v182_v31  ;;  %v2431_v56 = vmax.f32 %v110_v45, 1e-24  ;;  %v2433_v38 = vmax.f32 %v86_v15, 1e-24 }
  0xd8   :  { %v307_v1 = vmul.f32 %v291_v47, %v1884_v42  ;;  %v292_v10 = vmul.f32 20.0, %v186_v52  ;;  %v742_v22 = vunpack.c.l.b16 %v2210_v35  ;;  %1606 = vrsqrt.f32 %v2427_v6 }
  0xd9   :  { %v2438_v32 = vpop.eup %1600  ;;  %v1474_v34 = vpack.c.bf16 %v304_v19, %v303_v58  ;;  %vm233_vm9 = vweird.f32 %v2401_v3  ;;  %vm273_vm10 = vweird.f32 %v2406_v48  ;;  %1608 = vrsqrt.f32 %v2431_v56 }
  0xda   :  { %v2443_v43 = vpop.eup %1602  ;;  %v308_v62 = vmul.f32 %v292_v10, %v1888_v44  ;;  %v238_v42 = vmul.f32 %v2438_v32, %v2399_v40  ;;  %v755_v26 = vpack.c.b16 %v743_v7, %v742_v22  ;;  %1610 = vrsqrt.f32 %v2433_v38  ;;  %v92_v44 = vpop.xlane.xlu0 %91 }
  0xdb   :  { %v2449_v25 = vpop.eup %1604  ;;  %1475 = vst [vmem:[#allocation2] sm:$0xff] %v1474_v34   ;;  %v228_v23 = vmul.f32 %v2443_v43, %v2401_v3  ;;  %vm153_vm11 = vweird.f32 %v2427_v6  ;;  %v740_v27 = vunpack.c.l.b16 %v2252_v11  ;;  %v741_v12 = vunpack.c.l.b16 %v2240_v24 }
  0xdc   :  { %v1484_v13 = vpack.c.bf16 %v308_v62, %v307_v1  ;;  %v239_v4 = vmul.f32 %v2438_v32, %v238_v42  ;;  %vm244_vm12 = vweird.f32 %v2438_v32  ;;  %v268_v54 = vmul.f32 %v2449_v25, %v2406_v48 }
  0xdd   :  { %vm283_vm13 = vweird.f32 %v2431_v56  ;;  %v229_v21 = vmul.f32 %v2443_v43, %v228_v23  ;;  %vm234_vm14 = vweird.f32 %v2443_v43  ;;  %vm274_vm15 = vweird.f32 %v2449_v25  ;;  %772 = vmatpush.bf16.xpose.msra.mxu0 %v755_v26  ;;  %1530 = vmatpush.bf16.xpose.msra.mxu1 %v755_v26  ;;  %vm2487_vm1 = vmor %vm243_vm8, %vm244_vm12 }
  0xde   :  { %vm163_vm0 = vweird.f32 %v2433_v38  ;;  %v2465_v57 = vmax.f32 %v94_v0, 1e-24  ;;  %v2467_v16 = vpop.eup %1606  ;;  %1512 = vst [vmem:[#allocation2 + $0x10] sm:$0xff] %v1484_v13   ;;  %v240_v28 = vmul.f32 0.5, %v239_v4  ;;  %v269_v14 = vmul.f32 %v2449_v25, %v268_v54  ;;  %1531 = vmatpush.bf16.xpose.msra.mxu2 %v755_v26  ;;  %1532 = vmatpush.bf16.xpose.msra.mxu3 %v755_v26  ;;  %vm2500_vm3 = vmor %vm233_vm9, %vm234_vm14  ;;  %v1712_v13 = vld [vmem:[#allocation5 + $0x58] sm:$0xff] }
  0xdf   :  { %v754_v17 = vpack.c.b16 %v741_v12, %v740_v27  ;;  %v2470_v36 = vmax.f32 %v92_v44, 1e-24  ;;  %v2472_v37 = vpop.eup %1608  ;;  %v230_v55 = vmul.f32 0.5, %v229_v21  ;;  %v148_v45 = vmul.f32 %v2467_v16, %v2427_v6  ;;  %vm2511_vm5 = vmor %vm273_vm10, %vm274_vm15 }
  0xe0   :  { %1612 = vrsqrt.f32 %v2465_v57  ;;  %v738_v9 = vunpack.c.l.b16 %v2279_v60  ;;  %v2478_v8 = vpop.eup %1610  ;;  %v241_v50 = vsub.f32 1.5, %v240_v28  ;;  %v270_v5 = vmul.f32 0.5, %v269_v14  ;;  %v1713_v28 = vld [vmem:[#allocation5 + $0x50] sm:$0xff] }
  0xe1   :  { %v278_v18 = vmul.f32 %v2472_v37, %v2431_v56  ;;  %v739_v47 = vunpack.c.l.b16 %v2254_v51  ;;  %v231_v15 = vsub.f32 1.5, %v230_v55  ;;  %v149_v59 = vmul.f32 %v2467_v16, %v148_v45 }
  0xe2   :  { %vm154_vm2 = vweird.f32 %v2467_v16  ;;  %v158_v31 = vmul.f32 %v2478_v8, %v2433_v38  ;;  %v242_v58 = vmul.f32 %v2438_v32, %v241_v50  ;;  %v271_v7 = vsub.f32 1.5, %v270_v5  ;;  %v1714_v50 = vld [vmem:[#allocation5 + $0x70] sm:$0xff] }
  0xe3   :  { %v279_v19 = vmul.f32 %v2472_v37, %v278_v18  ;;  %vm284_vm4 = vweird.f32 %v2472_v37  ;;  %v232_v52 = vmul.f32 %v2443_v43, %v231_v15  ;;  %v150_v3 = vmul.f32 0.5, %v149_v59  ;;  %vm2534_vm7 = vmor %vm153_vm11, %vm154_vm2 }
  0xe4   :  { %v159_v10 = vmul.f32 %v2478_v8, %v158_v31  ;;  %1614 = vrsqrt.f32 %v2470_v36  ;;  %v246_v22 = vsel %vm2487_vm1, %v2438_v32, %v242_v58  ;;  %v272_v34 = vmul.f32 %v2449_v25, %v271_v7  ;;  %vm2545_vm8 = vmor %vm283_vm13, %vm284_vm4 }
  0xe5   :  { %v280_v62 = vmul.f32 0.5, %v279_v19  ;;  %vm164_vm6 = vweird.f32 %v2478_v8  ;;  %v298_v48 = vmul.f32 20.0, %v246_v22  ;;  %v236_v26 = vsel %vm2500_vm3, %v2443_v43, %v232_v52  ;;  %773 = vmatpush.bf16.xpose.msra.mxu0 %v754_v17  ;;  %1533 = vmatpush.bf16.xpose.msra.mxu1 %v754_v17  ;;  %v656_v19 = vld [vmem:[#allocation2] sm:$0xf]  ;;  %v1715_v52 = vld [vmem:[#allocation5 + $0x10] sm:$0xff]  ;;  %v1716_v22 = vld [vmem:[#allocation5 + $0x78] sm:$0xff] }
  0xe6   :  { %v2522_v42 = vpop.eup %1612  ;;  %v151_v0 = vsub.f32 1.5, %v150_v3  ;;  %v160_v23 = vmul.f32 0.5, %v159_v10  ;;  %v297_v27 = vmul.f32 20.0, %v236_v26  ;;  %v276_v32 = vsel %vm2511_vm5, %v2449_v25, %v272_v34  ;;  %1534 = vmatpush.bf16.xpose.msra.mxu2 %v754_v17  ;;  %1535 = vmatpush.bf16.xpose.msra.mxu3 %v754_v17  ;;  %vm2554_vm9 = vmor %vm163_vm0, %vm164_vm6 }
  0xe7   :  { %v281_v44 = vsub.f32 1.5, %v280_v62  ;;  %v198_v43 = vmul.f32 %v2522_v42, %v2465_v57  ;;  %v314_v4 = vmul.f32 %v1712_v13, %v298_v48  ;;  %v301_v54 = vmul.f32 20.0, %v276_v32 }
  0xe8   :  { %v152_v21 = vmul.f32 %v2467_v16, %v151_v0  ;;  %v161_v25 = vsub.f32 1.5, %v160_v23  ;;  %v313_v14 = vmul.f32 %v1713_v28, %v297_v27  ;;  %vm203_vm10 = vweird.f32 %v2465_v57 }
  0xe9   :  { %v282_v17 = vmul.f32 %v2472_v37, %v281_v44  ;;  %v199_v45 = vmul.f32 %v2522_v42, %v198_v43  ;;  %v317_v5 = vmul.f32 %v1714_v50, %v301_v54  ;;  %vm204_vm11 = vweird.f32 %v2522_v42 }
  0xea   :  { %v1615_v56 = vpop.eup %1614  ;;  %v156_v18 = vsel %vm2534_vm7, %v2467_v16, %v152_v21  ;;  %v162_v20 = vmul.f32 %v2478_v8, %v161_v25  ;;  %v1499_v38 = vpack.c.bf16 %v314_v4, %v313_v14  ;;  %v753_v16 = vpack.c.b16 %v739_v47, %v738_v9  ;;  %vm2578_vm12 = vmor %vm203_vm10, %vm204_vm11  ;;  %v1717_v9 = vld [vmem:[#allocation5 + $0x18] sm:$0xff] }
  0xeb   :  { %v289_v15 = vmul.f32 20.0, %v156_v18  ;;  %v286_v59 = vsel %vm2545_vm8, %v2472_v37, %v282_v17  ;;  %v200_v31 = vmul.f32 0.5, %v199_v45  ;;  %v188_v7 = vmul.f32 %v1615_v56, %v2470_v36  ;;  %v1718_v21 = vld [vmem:[#allocation5 + $0x38] sm:$0xff]  ;;  %v1465_v18 = vld [vmem:[#allocation2 + $0x10] sm:$0xff]  ;;  %v665_v37 = vld [vmem:[#allocation2 + $0x24] sm:$0xf] }
  0xec   :  { %v302_v58 = vmul.f32 20.0, %v286_v59  ;;  %v166_v40 = vsel %vm2554_vm9, %v2478_v8, %v162_v20  ;;  %1515 = vst [vmem:[#allocation2 + $0x28] sm:$0xff] %v1499_v38   ;;  %vm193_vm13 = vweird.f32 %v2470_v36  ;;  %vm194_vm14 = vweird.f32 %v1615_v56  ;;  %v1469_v59 = vld [vmem:[#allocation2 + $0x30] sm:$0xff] }
  0xed   :  { %v305_v1 = vmul.f32 %v1715_v52, %v289_v15  ;;  %v290_v3 = vmul.f32 20.0, %v166_v40  ;;  %v201_v10 = vsub.f32 1.5, %v200_v31  ;;  %v189_v8 = vmul.f32 %v1615_v56, %v188_v7  ;;  %774 = vmatpush.bf16.xpose.msra.mxu0 %v753_v16  ;;  %1536 = vmatpush.bf16.xpose.msra.mxu1 %v753_v16  ;;  %vm195_vm15 = vmor %vm193_vm13, %vm194_vm14  ;;  %v1467_v15 = vld [vmem:[#allocation2 + $0x20] sm:$0xff] }
  0xee   :  { %v318_v34 = vmul.f32 %v1716_v22, %v302_v58  ;;  %1537 = vmatpush.bf16.xpose.msra.mxu2 %v753_v16  ;;  %1538 = vmatpush.bf16.xpose.msra.mxu3 %v753_v16  ;;  %v1198_v48 = vunpack.c.l.bf16 %v656_v19  ;;  %v1214_v26 = vunpack.c.l.bf16 %v2416_v30  ;;  %v736_v23 = vunpack.c.l.b16 %v2416_v30 }
  0xef   :  { %v306_v47 = vmul.f32 %v1717_v9, %v290_v3  ;;  %v202_v62 = vmul.f32 %v2522_v42, %v201_v10  ;;  %v190_v0 = vmul.f32 0.5, %v189_v8  ;;  %v737_v27 = vunpack.c.l.b16 %v2413_v2 }
  0xf0   :  { %v1509_v57 = vpack.c.bf16 %v318_v34, %v317_v5  ;;  %v1230_v44 = vmul.f32 %v1214_v26, %v1198_v48  ;;  %v1215_v17 = vunpack.c.l.bf16 %v2413_v2  ;;  %v1217_v36 = vunpack.c.l.bf16 %v2254_v51  ;;  %v660_v2 = vld [vmem:[#allocation2 + $0x10] sm:$0xff]  }
  0xf1   :  { %v1479_v32 = vpack.c.bf16 %v306_v47, %v305_v1  ;;  %v206_v12 = vsel %vm2578_vm12, %v2522_v42, %v202_v62  ;;  %v191_v43 = vsub.f32 1.5, %v190_v0  ;;  %v752_v54 = vpack.c.b16 %v737_v27, %v736_v23  ;;  %v1719_v42 = vld [vmem:[#allocation5 + $0x30] sm:$0xff] }
  0xf2   :  { %1517 = vst [vmem:[#allocation2 + $0x38] sm:$0xff] %v1509_v57   ;;  %v294_v13 = vmul.f32 20.0, %v206_v12  ;;  %1246 = vadd.xlane.f32.xlu0 %v1230_v44  ;;  %v1216_v45 = vunpack.c.l.bf16 %v2279_v60  ;;  %v1202_v51 = vunpack.c.l.bf16 %v660_v2  ;;  %v1203_v60 = vunpack.c.h.bf16 %v660_v2 }
  0xf3   :  { %1511 = vst [vmem:[#allocation2 + $0x8] sm:$0xff] %v1479_v32   ;;  %v192_v4 = vmul.f32 %v1615_v56, %v191_v43  ;;  %v1218_v7 = vunpack.c.l.bf16 %v2252_v11  ;;  %v1219_v19 = vunpack.c.l.bf16 %v2240_v24  ;;  %v1220_v3 = vunpack.c.l.bf16 %v2210_v35  ;;  %v1468_v26 = vld [vmem:[#allocation2 + $0x28] sm:$0xff] }
  0xf4   :  { %v310_v6 = vmul.f32 %v1718_v21, %v294_v13  ;;  %v1221_v11 = vunpack.c.l.bf16 %v2216_v39  ;;  %v1207_v48 = vunpack.c.l.bf16 %v665_v37  ;;  %v1222_v57 = vunpack.c.l.bf16 %v2162_v53 }
  0xf5   :  { %v196_v30 = vsel %vm195_vm15, %v1615_v56, %v192_v4  ;;  %775 = vmatpush.bf16.xpose.msra.mxu0 %v752_v54  ;;  %1539 = vmatpush.bf16.xpose.msra.mxu1 %v752_v54  ;;  %v1463_v56 = vld [vmem:[#allocation2] sm:$0xff]  ;;  %v1234_v52 = vmul.f32 %v1218_v7, %v1202_v51  ;;  %v1235_v22 = vmul.f32 %v1219_v19, %v1203_v60  ;;  %v1223_v0 = vunpack.c.l.bf16 %v2142_v49 }
  0xf6   :  { %v293_v25 = vmul.f32 20.0, %v196_v30  ;;  %1540 = vmatpush.bf16.xpose.msra.mxu2 %v752_v54  ;;  %1541 = vmatpush.bf16.xpose.msra.mxu3 %v752_v54  ;;  %vm351_vm0 = vcmask 7168   ;;  %v818_v53 = vlaneseq }
  0xf7   :  { %v1239_v27 = vmul.f32 %v1223_v0, %v1207_v48 }
  0xf8   :  { %v309_v28 = vmul.f32 %v1719_v42, %v293_v25  ;;  %v2614_v44 = vand.u32 127, %v818_v53 }
  0xf9   :  { %v1470_v24 = vld [vmem:[#allocation2 + $0x38] sm:$0xff] }
  0xfa   :  { %v657_v14 = vld [vmem:[#allocation2 + $0x4] sm:$0xff]   ;;  %v659_v55 = vld [vmem:[#allocation2 + $0xc] sm:$0xf]  ;;  %v1489_v50 = vpack.c.bf16 %v310_v6, %v309_v28  ;;  %vm822_vm1 = vcmp.lt.s32.totalorder %v2614_v44, 8 }
  0xfb   :  { %v1199_v5 = vunpack.c.l.bf16 %v657_v14  ;;  %v1201_v20 = vunpack.c.l.bf16 %v659_v55  ;;  %v1200_v38 = vunpack.c.h.bf16 %v657_v14  ;;  %v1464_v62 = vld [vmem:[#allocation2 + $0x8] sm:$0xff] }
  0xfc   :  { %1513 = vst [vmem:[#allocation2 + $0x18] sm:$0xff] %v1489_v50   ;;  %776 = vmatmul.bf16.vlgmr.msra.gmra.mxu0 %v1463_v56  ;;  %786 = vmatmul.bf16.vlgmr.msra.gmra.mxu1 %v1465_v18  ;;  %v1776_v56 = vmov -inf  }
  0xfd   :  { %v1231_v31 = vmul.f32 %v1215_v17, %v1199_v5  ;;  %v1233_v58 = vmul.f32 %v1217_v36, %v1201_v20  ;;  %v1232_v40 = vmul.f32 %v1216_v45, %v1200_v38  ;;  %796 = vmatmul.bf16.vlgmr.msra.gmra.mxu2 %v1467_v15  ;;  %806 = vmatmul.bf16.vlgmr.msra.gmra.mxu3 %v1469_v59 }
  0xfe   :  { %356 = vst.msk [vmem:[#allocation3 + $0x20] sm:$0xff] %vm351_vm0, %v1776_v56 }
  0xff   :  { %1248 = vadd.xlane.f32.xlu1 %v1231_v31  ;;  %1252 = vadd.xlane.f32.xlu0 %v1233_v58  ;;  %352 = vst.msk [vmem:[#allocation3] sm:$0xff] %vm351_vm0, %v1776_v56 }
 0x100   :  { %1250 = vadd.xlane.f32.xlu2 %v1232_v40  ;;  %353 = vst.msk [vmem:[#allocation3 + $0x8] sm:$0xff] %vm351_vm0, %v1776_v56 }
 0x101   :  { %354 = vst.msk [vmem:[#allocation3 + $0x10] sm:$0xff] %vm351_vm0, %v1776_v56 }
 0x102   :  { %355 = vst.msk [vmem:[#allocation3 + $0x18] sm:$0xff] %vm351_vm0, %v1776_v56 }
 0x103   :  { %v662_v16 = vld [vmem:[#allocation2 + $0x18] sm:$0xf]  ;;  %v663_v10 = vld [vmem:[#allocation2 + $0x1c] sm:$0xff]   ;;  %357 = vst.msk [vmem:[#allocation3 + $0x28] sm:$0xff] %vm351_vm0, %v1776_v56 }
 0x104   :  { %v1204_v1 = vunpack.c.l.bf16 %v662_v16  ;;  %v1466_v8 = vld [vmem:[#allocation2 + $0x18] sm:$0xff]  ;;  %v1205_v9 = vunpack.c.l.bf16 %v663_v10  ;;  %v1206_v47 = vunpack.c.h.bf16 %v663_v10  ;;  %358 = vst.msk [vmem:[#allocation3 + $0x30] sm:$0xff] %vm351_vm0, %v1776_v56 }
 0x105   :  { %359 = vst.msk [vmem:[#allocation3 + $0x38] sm:$0xff] %vm351_vm0, %v1776_v56 }
 0x106   :  { %v1236_v34 = vmul.f32 %v1220_v3, %v1204_v1  ;;  %v1237_v35 = vmul.f32 %v1221_v11, %v1205_v9  ;;  %v1238_v23 = vmul.f32 %v1222_v57, %v1206_v47  ;;  %360 = vst.msk [vmem:[#allocation3 + $0x40] sm:$0xff] %vm351_vm0, %v1776_v56  ;;  %v2741_v9 = vld [vmem:[#allocation3] sm:$0xff] }
 0x107   :  { %1254 = vadd.xlane.f32.xlu1 %v1234_v52  ;;  %361 = vst.msk [vmem:[#allocation3 + $0x48] sm:$0xff] %vm351_vm0, %v1776_v56  ;;  %v2743_v47 = vld [vmem:[#allocation3 + $0x20] sm:$0xff] }
 0x108   :  { %1256 = vadd.xlane.f32.xlu2 %v1235_v22  ;;  %1258 = vadd.xlane.f32.xlu0 %v1236_v34  ;;  %362 = vst.msk [vmem:[#allocation3 + $0x50] sm:$0xff] %vm351_vm0, %v1776_v56 }
 0x109   :  { %363 = vst.msk [vmem:[#allocation3 + $0x58] sm:$0xff] %vm351_vm0, %v1776_v56 }
 0x10a   :  { %364 = vst.msk [vmem:[#allocation3 + $0x60] sm:$0xff] %vm351_vm0, %v1776_v56 }
 0x10b   :  { %365 = vst.msk [vmem:[#allocation3 + $0x68] sm:$0xff] %vm351_vm0, %v1776_v56 }
 0x10c   :  { %781 = vmatmul.bf16.gmra.mxu0 %v1464_v62  ;;  %791 = vmatmul.bf16.gmra.mxu1 %v1466_v8  ;;  %366 = vst.msk [vmem:[#allocation3 + $0x70] sm:$0xff] %vm351_vm0, %v1776_v56  ;;  %v1777_v8 = vmov 0  }
 0x10d   :  { %801 = vmatmul.bf16.gmra.mxu2 %v1468_v26  ;;  %811 = vmatmul.bf16.gmra.mxu3 %v1470_v24  ;;  %367 = vst.msk [vmem:[#allocation3 + $0x78] sm:$0xff] %vm351_vm0, %v1776_v56 }
 0x10e   :  { %1550 = vset.pattern.permute.xlu1 %v1777_v8  ;;  %1549 = vset.pattern.permute.xlu0 %v1777_v8 }
 0x10f   :  { %1260 = vadd.xlane.f32.xlu1 %v1237_v35  ;;  %1551 = vset.pattern.permute.xlu2 %v1777_v8  ;;  %v2761_v35 = vld [vmem:[#allocation3 + $0x40] sm:$0xff] }
 0x110   :  { %1262 = vadd.xlane.f32.xlu2 %v1238_v23  ;;  %1264 = vadd.xlane.f32.xlu0 %v1239_v27  ;;  %v2765_v27 = vld [vmem:[#allocation3 + $0x8] sm:$0xff] }
 0x111   :  { %v2763_v0 = vld [vmem:[#allocation3 + $0x60] sm:$0xff] }
 0x114   :  { %v2882_v56 = vld [vmem:[#allocation3 + $0x78] sm:$0xff] }
 0x115   :  { %3200 = vst [vmem:[#allocation14_spill] sm:$0xff] %v2882_v56 }
 0x165   :  { %v1247_v32 = vpop.xlane.xlu0 %1246 }
 0x166   :  { %1278 = vst.msk [vmem:[%s3141_s2] sm:$0xff] %vm351_vm0, %v1247_v32 }
 0x172   :  { %v1249_v39 = vpop.xlane.xlu1 %1248  ;;  %v1253_v12 = vpop.xlane.xlu0 %1252 }
 0x173   :  { %1279 = vst.msk [vmem:[%s3141_s2 + $0x8] sm:$0xff] %vm351_vm0, %v1249_v39  ;;  %v1251_v49 = vpop.xlane.xlu2 %1250 }
 0x174   :  { %1281 = vst.msk [vmem:[%s3141_s2 + $0x18] sm:$0xff] %vm351_vm0, %v1253_v12 }
 0x175   :  { %1280 = vst.msk [vmem:[%s3141_s2 + $0x10] sm:$0xff] %vm351_vm0, %v1251_v49 }
 0x179   :  { %v777_v13 = vpop.f32.mrf.mxu0  ;;  %v787_v4 = vpop.f32.mrf.mxu1 }
 0x17a   :  { %v1255_v43 = vpop.xlane.xlu1 %1254  ;;  %v2627_v54 = vsel %vm822_vm1, %v777_v13, -inf  ;;  %v2631_v21 = vsel %vm822_vm1, %v787_v4, -inf  ;;  %v2790_v4 = vld [vmem:[#allocation3 + $0x28] sm:$0xff] }
 0x17b   :  { %1282 = vst.msk [vmem:[%s3141_s2 + $0x20] sm:$0xff] %vm351_vm0, %v1255_v43  ;;  %v1257_v30 = vpop.xlane.xlu2 %1256  ;;  %857 = vmax.xlane.f32.xlu2 %v2627_v54  ;;  %v1259_v6 = vpop.xlane.xlu0 %1258  ;;  %865 = vmax.xlane.f32.xlu0 %v2631_v21 }
 0x17c   :  { %1283 = vst.msk [vmem:[%s3141_s2 + $0x28] sm:$0xff] %vm351_vm0, %v1257_v30  ;;  %v2792_v30 = vld [vmem:[#allocation3 + $0x48] sm:$0xff] }
 0x17d   :  { %1284 = vst.msk [vmem:[%s3141_s2 + $0x30] sm:$0xff] %vm351_vm0, %v1259_v6 }
 0x180   :  { %v797_v25 = vpop.f32.mrf.mxu2  ;;  %v807_v42 = vpop.f32.mrf.mxu3 }
 0x181   :  { %v779_v28 = vpop.f32.mrf.mxu0  ;;  %v2645_v14 = vsel %vm822_vm1, %v797_v25, -inf  ;;  %v2658_v36 = vsel %vm822_vm1, %v807_v42, -inf  ;;  %v789_v5 = vpop.f32.mrf.mxu1  ;;  %v2794_v25 = vld [vmem:[#allocation3 + $0x68] sm:$0xff] }
 0x182   :  { %v1261_v17 = vpop.xlane.xlu1 %1260  ;;  %873 = vmax.xlane.f32.xlu1 %v2645_v14  ;;  %v2654_v55 = vsel %vm822_vm1, %v779_v28, -inf  ;;  %v2676_v38 = vsel %vm822_vm1, %v789_v5, -inf }
 0x183   :  { %1285 = vst.msk [vmem:[%s3141_s2 + $0x38] sm:$0xff] %vm351_vm0, %v1261_v17  ;;  %v1263_v45 = vpop.xlane.xlu2 %1262  ;;  %881 = vmax.xlane.f32.xlu2 %v2658_v36  ;;  %v1265_v50 = vpop.xlane.xlu0 %1264  ;;  %859 = vmax.xlane.f32.xlu0 %v2654_v55 }
 0x184   :  { %1286 = vst.msk [vmem:[%s3141_s2 + $0x40] sm:$0xff] %vm351_vm0, %v1263_v45 }
 0x185   :  { %1287 = vst.msk [vmem:[%s3141_s2 + $0x48] sm:$0xff] %vm351_vm0, %v1265_v50 }
 0x188   :  { %v799_v18 = vpop.f32.mrf.mxu2  ;;  %v809_v20 = vpop.f32.mrf.mxu3 }
 0x189   :  { %v2682_v15 = vsel %vm822_vm1, %v799_v18, -inf  ;;  %v2687_v59 = vsel %vm822_vm1, %v809_v20, -inf  ;;  %v782_v31 = vpop.f32.mrf.mxu0  ;;  %v792_v58 = vpop.f32.mrf.mxu1  ;;  %v2820_v20 = vld [vmem:[#allocation3 + $0x10] sm:$0xff] }
 0x18a   :  { %867 = vmax.xlane.f32.xlu1 %v2676_v38  ;;  %v2699_v2 = vsel %vm822_vm1, %v782_v31, -inf  ;;  %v2705_v51 = vsel %vm822_vm1, %v792_v58, -inf  ;;  %v2822_v31 = vld [vmem:[#allocation3 + $0x30] sm:$0xff] }
 0x18b   :  { %875 = vmax.xlane.f32.xlu2 %v2682_v15  ;;  %883 = vmax.xlane.f32.xlu0 %v2687_v59 }
 0x190   :  { %v802_v40 = vpop.f32.mrf.mxu2  ;;  %v812_v7 = vpop.f32.mrf.mxu3 }
 0x191   :  { %v2710_v60 = vsel %vm822_vm1, %v802_v40, -inf  ;;  %v784_v16 = vpop.f32.mrf.mxu0  ;;  %v794_v19 = vpop.f32.mrf.mxu1  ;;  %v2718_v52 = vsel %vm822_vm1, %v812_v7, -inf  ;;  %v2824_v40 = vld [vmem:[#allocation3 + $0x50] sm:$0xff] }
 0x192   :  { %861 = vmax.xlane.f32.xlu1 %v2699_v2  ;;  %v2723_v1 = vsel %vm822_vm1, %v784_v16, -inf  ;;  %v2727_v3 = vsel %vm822_vm1, %v794_v19, -inf }
 0x193   :  { %869 = vmax.xlane.f32.xlu2 %v2705_v51  ;;  %877 = vmax.xlane.f32.xlu0 %v2710_v60 }
 0x198   :  { %v804_v10 = vpop.f32.mrf.mxu2  ;;  %v814_v22 = vpop.f32.mrf.mxu3 }
 0x199   :  { %v2733_v34 = vsel %vm822_vm1, %v804_v10, -inf  ;;  %v2738_v37 = vsel %vm822_vm1, %v814_v22, -inf }
 0x19a   :  { %885 = vmax.xlane.f32.xlu1 %v2718_v52 }
 0x19b   :  { %863 = vmax.xlane.f32.xlu2 %v2723_v1  ;;  %871 = vmax.xlane.f32.xlu0 %v2727_v3 }
 0x1a2   :  { %879 = vmax.xlane.f32.xlu1 %v2733_v34 }
 0x1a3   :  { %887 = vmax.xlane.f32.xlu2 %v2738_v37 }
 0x1ee   :  { %v858_v62 = vpop.xlane.xlu2 %857  ;;  %v866_v11 = vpop.xlane.xlu0 %865 }
 0x1ef   :  { %v2746_v48 = vmax.f32 %v2741_v9, %v858_v62  ;;  %v2749_v26 = vmax.f32 %v2743_v47, %v866_v11 }
 0x1f1   :  { %1178 = vst.msk [vmem:[#allocation3] sm:$0xff] %vm351_vm0, %v2746_v48  ;;  %987 = vperm.xlu0 %1549, %v2746_v48   ;;  %1007 = vperm.xlu1 %1550, %v2749_v26  }
 0x1f2   :  { %1182 = vst.msk [vmem:[#allocation3 + $0x20] sm:$0xff] %vm351_vm0, %v2749_v26 }
 0x1f5   :  { %v874_v23 = vpop.xlane.xlu1 %873 }
 0x1f6   :  { %v2768_v32 = vmax.f32 %v2761_v35, %v874_v23  ;;  %v882_v53 = vpop.xlane.xlu2 %881  ;;  %v860_v39 = vpop.xlane.xlu0 %859  ;;  %v2850_v23 = vld [vmem:[#allocation3 + $0x70] sm:$0xff] }
 0x1f7   :  { %v2771_v12 = vmax.f32 %v2763_v0, %v882_v53  ;;  %v2778_v44 = vmax.f32 %v2765_v27, %v860_v39  ;;  %v2852_v53 = vld [vmem:[#allocation3 + $0x18] sm:$0xff] }
 0x1f8   :  { %1186 = vst.msk [vmem:[#allocation3 + $0x40] sm:$0xff] %vm351_vm0, %v2768_v32  ;;  %1027 = vperm.xlu2 %1551, %v2768_v32  }
 0x1f9   :  { %1190 = vst.msk [vmem:[#allocation3 + $0x60] sm:$0xff] %vm351_vm0, %v2771_v12  ;;  %1047 = vperm.xlu1 %1550, %v2771_v12  }
 0x1fa   :  { %1179 = vst.msk [vmem:[#allocation3 + $0x8] sm:$0xff] %vm351_vm0, %v2778_v44 }
 0x1fb   :  { %3198 = vst [vmem:[#allocation12_spill] sm:$0xff] %v2852_v53 }
 0x1fd   :  { %v868_v6 = vpop.xlane.xlu1 %867 }
 0x1fe   :  { %v2797_v42 = vmax.f32 %v2790_v4, %v868_v6  ;;  %v876_v28 = vpop.xlane.xlu2 %875  ;;  %v884_v17 = vpop.xlane.xlu0 %883  ;;  %v2854_v6 = vld [vmem:[#allocation3 + $0x38] sm:$0xff] }
 0x1ff   :  { %v2800_v45 = vmax.f32 %v2792_v30, %v876_v28  ;;  %v2807_v5 = vmax.f32 %v2794_v25, %v884_v17 }
 0x200   :  { %1183 = vst.msk [vmem:[#allocation3 + $0x28] sm:$0xff] %vm351_vm0, %v2797_v42  ;;  %1012 = vperm.xlu2 %1551, %v2797_v42  }
 0x201   :  { %1187 = vst.msk [vmem:[#allocation3 + $0x48] sm:$0xff] %vm351_vm0, %v2800_v45  ;;  %1052 = vperm.xlu0 %1549, %v2807_v5   ;;  %992 = vperm.xlu1 %1550, %v2778_v44  }
 0x202   :  { %1191 = vst.msk [vmem:[#allocation3 + $0x68] sm:$0xff] %vm351_vm0, %v2807_v5 }
 0x205   :  { %v862_v58 = vpop.xlane.xlu1 %861 }
 0x206   :  { %v2827_v7 = vmax.f32 %v2820_v20, %v862_v58  ;;  %v870_v16 = vpop.xlane.xlu2 %869  ;;  %v878_v19 = vpop.xlane.xlu0 %877 }
 0x207   :  { %v2830_v10 = vmax.f32 %v2822_v31, %v870_v16  ;;  %v2837_v8 = vmax.f32 %v2824_v40, %v878_v19 }
 0x208   :  { %1180 = vst.msk [vmem:[#allocation3 + $0x10] sm:$0xff] %vm351_vm0, %v2827_v7  ;;  %997 = vperm.xlu2 %1551, %v2827_v7  }
 0x209   :  { %3197 = vst [vmem:[#allocation11_spill] sm:$0xff] %v2830_v10  ;;  %1037 = vperm.xlu0 %1549, %v2837_v8   ;;  %1032 = vperm.xlu1 %1550, %v2800_v45  }
 0x20a   :  { %1184 = vst.msk [vmem:[#allocation3 + $0x30] sm:$0xff] %vm351_vm0, %v2830_v10 }
 0x20b   :  { %1188 = vst.msk [vmem:[#allocation3 + $0x50] sm:$0xff] %vm351_vm0, %v2837_v8 }
 0x20d   :  { %v886_v39 = vpop.xlane.xlu1 %885 }
 0x20e   :  { %v2857_v28 = vmax.f32 %v2850_v23, %v886_v39  ;;  %v864_v17 = vpop.xlane.xlu2 %863  ;;  %v872_v58 = vpop.xlane.xlu0 %871 }
 0x20f   :  { %v2860_v16 = vmax.f32 %v2852_v53, %v864_v17  ;;  %v2867_v62 = vmax.f32 %v2854_v6, %v872_v58  ;;  %v2880_v58 = vld [vmem:[#allocation3 + $0x58] sm:$0xff] }
 0x210   :  { %1192 = vst.msk [vmem:[#allocation3 + $0x70] sm:$0xff] %vm351_vm0, %v2857_v28  ;;  %1057 = vperm.xlu2 %1551, %v2857_v28  }
 0x211   :  { %3199 = vst [vmem:[#allocation13_spill] sm:$0xff] %v2860_v16  ;;  %1022 = vperm.xlu0 %1549, %v2867_v62   ;;  %1017 = vperm.xlu1 %1550, %v2830_v10  }
 0x212   :  { %1181 = vst.msk [vmem:[#allocation3 + $0x18] sm:$0xff] %vm351_vm0, %v2860_v16 }
 0x213   :  { %1185 = vst.msk [vmem:[#allocation3 + $0x38] sm:$0xff] %vm351_vm0, %v2867_v62 }
 0x215   :  { %v880_v11 = vpop.xlane.xlu1 %879 }
 0x216   :  { %v2885_v39 = vmax.f32 %v2880_v58, %v880_v11  ;;  %v888_v13 = vpop.xlane.xlu2 %887  ;;  %v1778_v11 = vmov 0.0  }
 0x217   :  { %v2888_v18 = vmax.f32 %v2882_v56, %v888_v13  ;;  %376 = vst.msk [vmem:[#allocation4 + $0x40] sm:$0xff] %vm351_vm0, %v1778_v11 }
 0x218   :  { %1189 = vst.msk [vmem:[#allocation3 + $0x58] sm:$0xff] %vm351_vm0, %v2885_v39  ;;  %1002 = vperm.xlu2 %1551, %v2860_v16  }
 0x219   :  { %3201 = vst [vmem:[#allocation15_spill] sm:$0xff] %v2888_v18  ;;  %1062 = vperm.xlu1 %1550, %v2888_v18  }
 0x21a   :  { %1193 = vst.msk [vmem:[#allocation3 + $0x78] sm:$0xff] %vm351_vm0, %v2888_v18 }
 0x21b   :  { %368 = vst.msk [vmem:[#allocation4] sm:$0xff] %vm351_vm0, %v1778_v11 }
 0x21c   :  { %369 = vst.msk [vmem:[#allocation4 + $0x8] sm:$0xff] %vm351_vm0, %v1778_v11 }
 0x21d   :  { %370 = vst.msk [vmem:[#allocation4 + $0x10] sm:$0xff] %vm351_vm0, %v1778_v11 }
 0x21e   :  { %371 = vst.msk [vmem:[#allocation4 + $0x18] sm:$0xff] %vm351_vm0, %v1778_v11 }
 0x21f   :  { %372 = vst.msk [vmem:[#allocation4 + $0x20] sm:$0xff] %vm351_vm0, %v1778_v11 }
 0x220   :  { %1042 = vperm.xlu2 %1551, %v2885_v39   ;;  %373 = vst.msk [vmem:[#allocation4 + $0x28] sm:$0xff] %vm351_vm0, %v1778_v11 }
 0x221   :  { %374 = vst.msk [vmem:[#allocation4 + $0x30] sm:$0xff] %vm351_vm0, %v1778_v11 }
 0x222   :  { %375 = vst.msk [vmem:[#allocation4 + $0x38] sm:$0xff] %vm351_vm0, %v1778_v11 }
 0x223   :  { %377 = vst.msk [vmem:[#allocation4 + $0x48] sm:$0xff] %vm351_vm0, %v1778_v11 }
 0x224   :  { %378 = vst.msk [vmem:[#allocation4 + $0x50] sm:$0xff] %vm351_vm0, %v1778_v11 }
 0x225   :  { %379 = vst.msk [vmem:[#allocation4 + $0x58] sm:$0xff] %vm351_vm0, %v1778_v11 }
 0x226   :  { %380 = vst.msk [vmem:[#allocation4 + $0x60] sm:$0xff] %vm351_vm0, %v1778_v11 }
 0x227   :  { %381 = vst.msk [vmem:[#allocation4 + $0x68] sm:$0xff] %vm351_vm0, %v1778_v11 }
 0x228   :  { %382 = vst.msk [vmem:[#allocation4 + $0x70] sm:$0xff] %vm351_vm0, %v1778_v11 }
 0x229   :  { %383 = vst.msk [vmem:[#allocation4 + $0x78] sm:$0xff] %vm351_vm0, %v1778_v11 }
 0x252   :  { %v1028_v13 = vpop.permute.xlu2 %1027 }
 0x253   :  { %v1073_v43 = vsub.f32 %v2645_v14, %v1028_v13 }
 0x255   :  { %v1097_v17 = vmul.f32 1.442695, %v1073_v43 }
 0x257   :  { %1616 = vpow2.f32 %v1097_v17 }
 0x25a   :  { %v1013_v57 = vpop.permute.xlu2 %1012 }
 0x25b   :  { %v1070_v19 = vsub.f32 %v2676_v38, %v1013_v57 }
 0x25d   :  { %v1617_v24 = vpop.eup %1616  ;;  %v1091_v22 = vmul.f32 1.442695, %v1070_v19 }
 0x25e   :  { %1129 = vadd.xlane.f32.xlu1 %v1617_v24 }
 0x25f   :  { %1618 = vpow2.f32 %v1091_v22 }
 0x262   :  { %v998_v50 = vpop.permute.xlu2 %997 }
 0x263   :  { %v1067_v49 = vsub.f32 %v2699_v2, %v998_v50  ;;  %v988_v18 = vpop.permute.xlu0 %987  ;;  %v1008_v56 = vpop.permute.xlu1 %1007 }
 0x264   :  { %v1065_v16 = vsub.f32 %v2627_v54, %v988_v18  ;;  %v1069_v14 = vsub.f32 %v2631_v21, %v1008_v56 }
 0x265   :  { %v1619_v11 = vpop.eup %1618  ;;  %v1085_v53 = vmul.f32 1.442695, %v1067_v49 }
 0x266   :  { %v1081_v10 = vmul.f32 1.442695, %v1065_v16  ;;  %1123 = vadd.xlane.f32.xlu1 %v1619_v11  ;;  %v1089_v24 = vmul.f32 1.442695, %v1069_v14 }
 0x267   :  { %1620 = vpow2.f32 %v1085_v53 }
 0x268   :  { %1622 = vpow2.f32 %v1081_v10 }
 0x26a   :  { %v1058_v38 = vpop.permute.xlu2 %1057 }
 0x26b   :  { %v1079_v57 = vsub.f32 %v2718_v52, %v1058_v38  ;;  %v1048_v43 = vpop.permute.xlu1 %1047 }
 0x26c   :  { %v1077_v2 = vsub.f32 %v2658_v36, %v1048_v43 }
 0x26d   :  { %v1621_v22 = vpop.eup %1620  ;;  %v1109_v19 = vmul.f32 1.442695, %v1079_v57 }
 0x26e   :  { %v1623_v50 = vpop.eup %1622  ;;  %1117 = vadd.xlane.f32.xlu1 %v1621_v22  ;;  %v1105_v54 = vmul.f32 1.442695, %v1077_v2 }
 0x26f   :  { %1624 = vpow2.f32 %v1109_v19  ;;  %1113 = vadd.xlane.f32.xlu0 %v1623_v50 }
 0x270   :  { %1626 = vpow2.f32 %v1089_v24 }
 0x271   :  { %1628 = vpow2.f32 %v1105_v54 }
 0x272   :  { %v1003_v49 = vpop.permute.xlu2 %1002 }
 0x273   :  { %v1053_v18 = vpop.permute.xlu0 %1052  ;;  %v993_v21 = vpop.permute.xlu1 %992 }
 0x274   :  { %v1078_v10 = vsub.f32 %v2687_v59, %v1053_v18  ;;  %v1066_v52 = vsub.f32 %v2654_v55, %v993_v21  ;;  %v666_v21 = vld [vmem:[#allocation2 + $0x28] sm:$0xff]  }
 0x275   :  { %v1625_v56 = vpop.eup %1624 }
 0x276   :  { %v1627_v53 = vpop.eup %1626  ;;  %1141 = vadd.xlane.f32.xlu1 %v1625_v56  ;;  %v1107_v17 = vmul.f32 1.442695, %v1078_v10  ;;  %v1083_v36 = vmul.f32 1.442695, %v1066_v52  ;;  %v1208_v52 = vunpack.c.l.bf16 %v666_v21 }
 0x277   :  { %v1629_v16 = vpop.eup %1628  ;;  %1121 = vadd.xlane.f32.xlu0 %v1627_v53  ;;  %v1068_v53 = vsub.f32 %v2723_v1, %v1003_v49 }
 0x278   :  { %1137 = vadd.xlane.f32.xlu2 %v1629_v16  ;;  %1630 = vpow2.f32 %v1107_v17  ;;  %v1224_v16 = vunpack.c.l.bf16 %v2040_v29  ;;  %v1226_v29 = vunpack.c.l.bf16 %v2034_v63 }
 0x279   :  { %1632 = vpow2.f32 %v1083_v36  ;;  %v669_v36 = vld [vmem:[#allocation2 + $0x34] sm:$0xff]  }
 0x27a   :  { %v1043_v13 = vpop.permute.xlu2 %1042  ;;  %v1240_v17 = vmul.f32 %v1224_v16, %v1208_v52  ;;  %v1212_v63 = vunpack.c.h.bf16 %v669_v36 }
 0x27b   :  { %v1076_v11 = vsub.f32 %v2733_v34, %v1043_v13  ;;  %v1038_v14 = vpop.permute.xlu0 %1037  ;;  %v1033_v38 = vpop.permute.xlu1 %1032 }
 0x27c   :  { %v1075_v24 = vsub.f32 %v2710_v60, %v1038_v14  ;;  %v1074_v59 = vsub.f32 %v2682_v15, %v1033_v38  ;;  %v1211_v38 = vunpack.c.l.bf16 %v669_v36  ;;  %v3205_v36 = vsub.f32 %v2741_v9, %v2746_v48 }
 0x27d   :  { %v1103_v57 = vmul.f32 1.442695, %v1076_v11  ;;  %v668_v11 = vld [vmem:[#allocation2 + $0x30] sm:$0xf]  ;;  %v3208_v48 = vsub.f32 %v2763_v0, %v2771_v12  ;;  %v3209_v12 = vsub.f32 %v2794_v25, %v2807_v5 }
 0x27e   :  { %v1631_v55 = vpop.eup %1630  ;;  %v1101_v43 = vmul.f32 1.442695, %v1075_v24  ;;  %v1099_v22 = vmul.f32 1.442695, %v1074_v59  ;;  %v1227_v24 = vunpack.c.l.bf16 %v2071_v46  ;;  %v1210_v1 = vunpack.c.l.bf16 %v668_v11 }
 0x27f   :  { %1634 = vpow2.f32 %v1103_v57  ;;  %v1633_v19 = vpop.eup %1632  ;;  %1139 = vadd.xlane.f32.xlu0 %v1631_v55  ;;  %v1209_v46 = vunpack.c.h.bf16 %v666_v21  ;;  %v961_v21 = vld [vmem:[#allocation4 + $0x40] sm:$0xff] }
 0x280   :  { %1636 = vpow2.f32 %v1101_v43  ;;  %1115 = vadd.xlane.f32.xlu2 %v1633_v19  ;;  %v1243_v49 = vmul.f32 %v1227_v24, %v1211_v38  ;;  %v1242_v55 = vmul.f32 %v1226_v29, %v1210_v1  ;;  %v671_v43 = vld [vmem:[#allocation2 + $0x3c] sm:$0xf]  ;;  %v945_v38 = vmul.f32 1.442695, %v3208_v48  ;;  %v953_v1 = vld [vmem:[#allocation4] sm:$0xff]  ;;  %v1299_v48 = vld [vmem:[#allocation3 + $0x10] sm:$0xff] }
 0x281   :  { %1638 = vpow2.f32 %v1099_v22  ;;  %v1213_v19 = vunpack.c.l.bf16 %v671_v43 }
 0x283   :  { %v1023_v2 = vpop.permute.xlu0 %1022  ;;  %v1018_v50 = vpop.permute.xlu1 %1017 }
 0x284   :  { %v1072_v34 = vsub.f32 %v2727_v3, %v1023_v2  ;;  %v1071_v18 = vsub.f32 %v2705_v51, %v1018_v50  ;;  %v1087_v3 = vmul.f32 1.442695, %v1068_v53  ;;  %v1229_v2 = vunpack.c.l.bf16 %v2065_v41 }
 0x285   :  { %v1635_v54 = vpop.eup %1634  ;;  %v3203_v41 = vsub.f32 %v2790_v4, %v2797_v42 }
 0x286   :  { %1135 = vadd.xlane.f32.xlu1 %v1635_v54  ;;  %v1637_v60 = vpop.eup %1636  ;;  %v1095_v15 = vmul.f32 1.442695, %v1072_v34  ;;  %v1093_v56 = vmul.f32 1.442695, %v1071_v18  ;;  %v1245_v50 = vmul.f32 %v1229_v2, %v1213_v19  ;;  %v1228_v18 = vunpack.c.l.bf16 %v2017_v61 }
 0x287   :  { %v1639_v10 = vpop.eup %1638  ;;  %1133 = vadd.xlane.f32.xlu0 %v1637_v60  ;;  %v3204_v61 = vsub.f32 %v2820_v20, %v2827_v7  ;;  %v3207_v20 = vsub.f32 %v2743_v47, %v2749_v26  ;;  %v947_v19 = vmul.f32 1.442695, %v3209_v12 }
 0x288   :  { %1640 = vpow2.f32 %v1095_v15  ;;  %1131 = vadd.xlane.f32.xlu2 %v1639_v10  ;;  %v1244_v60 = vmul.f32 %v1228_v18, %v1212_v63  ;;  %v3202_v15 = vsub.f32 %v2761_v35, %v2768_v32  ;;  %v931_v10 = vmul.f32 1.442695, %v3203_v41  ;;  %v957_v63 = vld [vmem:[#allocation4 + $0x20] sm:$0xff] }
 0x289   :  { %1642 = vpow2.f32 %v1093_v56  ;;  %v921_v35 = vmul.f32 1.442695, %v3205_v36  ;;  %v929_v7 = vmul.f32 1.442695, %v3207_v20 }
 0x28a   :  { %1644 = vpow2.f32 %v1087_v3  ;;  %v937_v56 = vmul.f32 1.442695, %v3202_v15  ;;  %v958_v3 = vld [vmem:[#allocation4 + $0x28] sm:$0xff]  ;;  %v965_v15 = vld [vmem:[#allocation4 + $0x60] sm:$0xff] }
 0x28b   :  { %v1063_v13 = vpop.permute.xlu1 %1062 }
 0x28c   :  { %v1080_v57 = vsub.f32 %v2738_v37, %v1063_v13  ;;  %v1225_v37 = vunpack.c.l.bf16 %v2077_v33  ;;  %v3206_v13 = vsub.f32 %v2850_v23, %v2857_v28 }
 0x28e   :  { %1266 = vadd.xlane.f32.xlu1 %v1240_v17  ;;  %v1641_v51 = vpop.eup %1640  ;;  %v1111_v59 = vmul.f32 1.442695, %v1080_v57  ;;  %v1241_v34 = vmul.f32 %v1225_v37, %v1209_v46  ;;  %v925_v17 = vmul.f32 1.442695, %v3204_v61  ;;  %v949_v11 = vmul.f32 1.442695, %v3206_v13 }
 0x28f   :  { %v1643_v14 = vpop.eup %1642  ;;  %1127 = vadd.xlane.f32.xlu0 %v1641_v51  ;;  %v955_v57 = vld [vmem:[#allocation4 + $0x10] sm:$0xff]  ;;  %v1385_v46 = vld [vmem:[%s3141_s2 + $0x40] sm:$0xff]  ;;  %v3210_v37 = vsub.f32 %v2765_v27, %v2778_v44  ;;  %v3211_v27 = vsub.f32 %v2880_v58, %v2885_v39  ;;  %v1382_v39 = vld [vmem:[%s3141_s2 + $0x28] sm:$0xff]  ;;  %v3213_v58 = vsub.f32 %v2792_v30, %v2800_v45 }
 0x290   :  { %1125 = vadd.xlane.f32.xlu2 %v1643_v14  ;;  %v1645_v22 = vpop.eup %1644  ;;  %1646 = vpow2.f32 %v1111_v59 }
 0x291   :  { %1648 = vpow2.f32 %v937_v56  ;;  %v943_v44 = vmul.f32 1.442695, %v3211_v27 }
 0x292   :  { %1650 = vpow2.f32 %v931_v10 }
 0x293   :  { %1652 = vpow2.f32 %v925_v17  ;;  %v1302_v17 = vld [vmem:[#allocation3 + $0x28] sm:$0xff] }
 0x294   :  { %1654 = vpow2.f32 %v921_v35 }
 0x296   :  { %1272 = vadd.xlane.f32.xlu1 %v1243_v49  ;;  %v1647_v54 = vpop.eup %1646 }
 0x297   :  { %1270 = vadd.xlane.f32.xlu0 %v1242_v55  ;;  %v1649_v52 = vpop.eup %1648 }
 0x298   :  { %1119 = vadd.xlane.f32.xlu2 %v1645_v22  ;;  %v977_v33 = vmul.f32 %v1649_v52, %v961_v21  ;;  %v1651_v32 = vpop.eup %1650  ;;  %v1305_v22 = vld [vmem:[#allocation3 + $0x40] sm:$0xff] }
 0x299   :  { %v974_v4 = vmul.f32 %v1651_v32, %v958_v3  ;;  %v1653_v9 = vpop.eup %1652  ;;  %v3212_v32 = vsub.f32 %v2824_v40, %v2837_v8  ;;  %v954_v8 = vld [vmem:[#allocation4 + $0x8] sm:$0xff] }
 0x29a   :  { %v1655_v24 = vpop.eup %1654  ;;  %v971_v23 = vmul.f32 %v1653_v9, %v955_v57 }
 0x29b   :  { %v969_v49 = vmul.f32 %v1655_v24, %v953_v1  ;;  %v941_v3 = vmul.f32 1.442695, %v3212_v32  ;;  %v959_v32 = vld [vmem:[#allocation4 + $0x30] sm:$0xff] }
 0x29f   :  { %1276 = vadd.xlane.f32.xlu0 %v1245_v50  ;;  %v967_v50 = vld [vmem:[#allocation4 + $0x70] sm:$0xff] }
 0x2a0   :  { %1143 = vadd.xlane.f32.xlu2 %v1647_v54 }
 0x2a8   :  { %1268 = vadd.xlane.f32.xlu2 %v1241_v34  ;;  %v923_v34 = vmul.f32 1.442695, %v3210_v37  ;;  %v962_v37 = vld [vmem:[#allocation4 + $0x48] sm:$0xff] }
 0x2b0   :  { %1274 = vadd.xlane.f32.xlu2 %v1244_v60 }
 0x2d1   :  { %v1130_v53 = vpop.xlane.xlu1 %1129 }
 0x2d2   :  { %v1153_v16 = vadd.f32 %v1130_v53, %v977_v33 }
 0x2d4   :  { %1170 = vst.msk [vmem:[#allocation4 + $0x40] sm:$0xff] %vm351_vm0, %v1153_v16 }
 0x2d9   :  { %v1124_v42 = vpop.xlane.xlu1 %1123 }
 0x2da   :  { %v1150_v51 = vadd.f32 %v1124_v42, %v974_v4  ;;  %v939_v42 = vmul.f32 1.442695, %v3213_v58 }
 0x2db   :  { %v1321_v14 = vld [vmem:[#allocation4 + $0x40] sm:$0xff] }
 0x2dc   :  { %1656 = vlog2.f32 %v1321_v14  ;;  %1167 = vst.msk [vmem:[#allocation4 + $0x28] sm:$0xff] %vm351_vm0, %v1150_v51 }
 0x2dd   :  { %1658 = vpow2.f32 %v949_v11  ;;  %v966_v11 = vld [vmem:[#allocation4 + $0x68] sm:$0xff] }
 0x2de   :  { %1660 = vpow2.f32 %v929_v7 }
 0x2df   :  { %1662 = vpow2.f32 %v945_v38 }
 0x2e1   :  { %v1118_v28 = vpop.xlane.xlu1 %1117 }
 0x2e2   :  { %v1657_v29 = vpop.eup %1656  ;;  %v1147_v47 = vadd.f32 %v1118_v28, %v971_v23  ;;  %v1114_v26 = vpop.xlane.xlu0 %1113  ;;  %v1297_v28 = vld [vmem:[#allocation3] sm:$0xff] }
 0x2e3   :  { %v1346_v59 = vmul.f32 0.6931472, %v1657_v29  ;;  %v1318_v55 = vld [vmem:[#allocation4 + $0x28] sm:$0xff]  ;;  %v1145_v43 = vadd.f32 %v1114_v26, %v969_v49  ;;  %v1659_v0 = vpop.eup %1658  ;;  %v3214_v49 = vsub.f32 %v2854_v6, %v2867_v62  ;;  %v1377_v62 = vld [vmem:[%s3141_s2] sm:$0xff] }
 0x2e4   :  { %1664 = vlog2.f32 %v1318_v55  ;;  %1164 = vst.msk [vmem:[#allocation4 + $0x10] sm:$0xff] %vm351_vm0, %v1147_v47  ;;  %v1661_v54 = vpop.eup %1660  ;;  %v983_v56 = vmul.f32 %v1659_v0, %v967_v50  ;;  %v1379_v55 = vld [vmem:[%s3141_s2 + $0x10] sm:$0xff] }
 0x2e5   :  { %v1369_v2 = vadd.f32 %v1346_v59, %v1305_v22  ;;  %1162 = vst.msk [vmem:[#allocation4] sm:$0xff] %vm351_vm0, %v1145_v43  ;;  %v1663_v18 = vpop.eup %1662  ;;  %1666 = vpow2.f32 %v947_v19  ;;  %v973_v5 = vmul.f32 %v1661_v54, %v957_v63  ;;  %v935_v29 = vmul.f32 1.442695, %v3214_v49  ;;  %v964_v59 = vld [vmem:[#allocation4 + $0x58] sm:$0xff]  ;;  %v3215_v43 = vld [vmem:[#allocation11_spill] sm:$0xff] }
 0x2e6   :  { %1668 = vpow2.f32 %v923_v34  ;;  %v981_v21 = vmul.f32 %v1663_v18, %v965_v15  ;;  %v3216_v22 = vsub.f32 %v2822_v31, %v3215_v43 }
 0x2e7   :  { %v1401_v60 = vsub.f32 %v1369_v2, %v1385_v46  ;;  %v963_v2 = vld [vmem:[#allocation4 + $0x50] sm:$0xff] }
 0x2e8   :  { %v933_v0 = vmul.f32 1.442695, %v3216_v22 }
 0x2e9   :  { %1417 = vst.msk [vmem:[%s3141_s2 + $0x40] sm:$0xff] %vm351_vm0, %v1401_v60  ;;  %v1142_v25 = vpop.xlane.xlu1 %1141 }
 0x2ea   :  { %v1665_v41 = vpop.eup %1664  ;;  %v1159_v10 = vadd.f32 %v1142_v25, %v983_v56  ;;  %v1122_v52 = vpop.xlane.xlu0 %1121 }
 0x2eb   :  { %v1340_v33 = vmul.f32 0.6931472, %v1665_v41  ;;  %v1315_v53 = vld [vmem:[#allocation4 + $0x10] sm:$0xff]  ;;  %v1149_v16 = vadd.f32 %v1122_v52, %v973_v5  ;;  %v1138_v61 = vpop.xlane.xlu2 %1137  ;;  %v1667_v51 = vpop.eup %1666  ;;  %v1301_v41 = vld [vmem:[#allocation3 + $0x20] sm:$0xff]  ;;  %v3217_v52 = vld [vmem:[#allocation12_spill] sm:$0xff] }
 0x2ec   :  { %1670 = vlog2.f32 %v1315_v53  ;;  %v1313_v36 = vld [vmem:[#allocation4] sm:$0xff]  ;;  %1176 = vst.msk [vmem:[#allocation4 + $0x70] sm:$0xff] %vm351_vm0, %v1159_v10  ;;  %v1157_v35 = vadd.f32 %v1138_v61, %v981_v21  ;;  %v1669_v40 = vpop.eup %1668  ;;  %v982_v20 = vmul.f32 %v1667_v51, %v966_v11  ;;  %v3218_v21 = vld [vmem:[#allocation13_spill] sm:$0xff] }
 0x2ed   :  { %v1366_v4 = vadd.f32 %v1340_v33, %v1302_v17  ;;  %1672 = vlog2.f32 %v1313_v36  ;;  %1166 = vst.msk [vmem:[#allocation4 + $0x20] sm:$0xff] %vm351_vm0, %v1149_v16  ;;  %v970_v9 = vmul.f32 %v1669_v40, %v954_v8  ;;  %v3219_v27 = vsub.f32 %v3217_v52, %v3218_v21  ;;  %v1381_v61 = vld [vmem:[%s3141_s2 + $0x20] sm:$0xff]  ;;  %v960_v17 = vld [vmem:[#allocation4 + $0x38] sm:$0xff] }
 0x2ee   :  { %1174 = vst.msk [vmem:[#allocation4 + $0x60] sm:$0xff] %vm351_vm0, %v1157_v35  ;;  %1674 = vpow2.f32 %v943_v44  ;;  %v1309_v52 = vld [vmem:[#allocation3 + $0x60] sm:$0xff] }
 0x2ef   :  { %v1398_v13 = vsub.f32 %v1366_v4, %v1382_v39  ;;  %1676 = vpow2.f32 %v941_v3  ;;  %v927_v44 = vmul.f32 1.442695, %v3219_v27 }
 0x2f0   :  { %1678 = vpow2.f32 %v939_v42 }
 0x2f1   :  { %1414 = vst.msk [vmem:[%s3141_s2 + $0x28] sm:$0xff] %vm351_vm0, %v1398_v13 }
 0x2f2   :  { %v1671_v14 = vpop.eup %1670  ;;  %v1140_v45 = vpop.xlane.xlu0 %1139 }
 0x2f3   :  { %v1673_v7 = vpop.eup %1672  ;;  %v1334_v30 = vmul.f32 0.6931472, %v1671_v14  ;;  %v1158_v24 = vadd.f32 %v1140_v45, %v982_v20  ;;  %v1116_v1 = vpop.xlane.xlu2 %1115  ;;  %v3220_v20 = vld [vmem:[#allocation14_spill] sm:$0xff] }
 0x2f4   :  { %v1330_v38 = vmul.f32 0.6931472, %v1673_v7  ;;  %v1317_v57 = vld [vmem:[#allocation4 + $0x20] sm:$0xff]  ;;  %v1675_v23 = vpop.eup %1674  ;;  %v1146_v26 = vadd.f32 %v1116_v1, %v970_v9  ;;  %v956_v1 = vld [vmem:[#allocation4 + $0x18] sm:$0xff] }
 0x2f5   :  { %v1363_v47 = vadd.f32 %v1334_v30, %v1299_v48  ;;  %1680 = vlog2.f32 %v1317_v57  ;;  %1175 = vst.msk [vmem:[#allocation4 + $0x68] sm:$0xff] %vm351_vm0, %v1158_v24  ;;  %v1677_v19 = vpop.eup %1676  ;;  %v980_v46 = vmul.f32 %v1675_v23, %v964_v59  ;;  %v1325_v58 = vld [vmem:[#allocation4 + $0x60] sm:$0xff] }
 0x2f6   :  { %v1361_v12 = vadd.f32 %v1330_v38, %v1297_v28  ;;  %1163 = vst.msk [vmem:[#allocation4 + $0x8] sm:$0xff] %vm351_vm0, %v1146_v26  ;;  %v1679_v50 = vpop.eup %1678  ;;  %1682 = vpow2.f32 %v935_v29  ;;  %v979_v63 = vmul.f32 %v1677_v19, %v963_v2  ;;  %v3221_v7 = vld [vmem:[#allocation15_spill] sm:$0xff]  ;;  %v1298_v38 = vld [vmem:[#allocation3 + $0x8] sm:$0xff]  ;;  %v1307_v2 = vld [vmem:[#allocation3 + $0x50] sm:$0xff] }
 0x2f7   :  { %v1395_v6 = vsub.f32 %v1363_v47, %v1379_v55  ;;  %1684 = vpow2.f32 %v933_v0  ;;  %v978_v15 = vmul.f32 %v1679_v50, %v962_v37  ;;  %v3222_v30 = vsub.f32 %v3220_v20, %v3221_v7  ;;  %v1378_v28 = vld [vmem:[%s3141_s2 + $0x8] sm:$0xff] }
 0x2f8   :  { %v1393_v54 = vsub.f32 %v1361_v12, %v1377_v62  ;;  %v1310_v37 = vld [vmem:[#allocation3 + $0x68] sm:$0xff] }
 0x2f9   :  { %1411 = vst.msk [vmem:[%s3141_s2 + $0x10] sm:$0xff] %vm351_vm0, %v1395_v6  ;;  %v1136_v31 = vpop.xlane.xlu1 %1135  ;;  %v951_v45 = vmul.f32 1.442695, %v3222_v30 }
 0x2fa   :  { %1409 = vst.msk [vmem:[%s3141_s2] sm:$0xff] %vm351_vm0, %v1393_v54  ;;  %v1156_v34 = vadd.f32 %v1136_v31, %v980_v46  ;;  %v1134_v60 = vpop.xlane.xlu0 %1133  ;;  %v1306_v54 = vld [vmem:[#allocation3 + $0x48] sm:$0xff] }
 0x2fb   :  { %v1681_v18 = vpop.eup %1680  ;;  %v1155_v25 = vadd.f32 %v1134_v60, %v979_v63  ;;  %v1132_v5 = vpop.xlane.xlu2 %1131 }
 0x2fc   :  { %v1338_v56 = vmul.f32 0.6931472, %v1681_v18  ;;  %1173 = vst.msk [vmem:[#allocation4 + $0x58] sm:$0xff] %vm351_vm0, %v1156_v34  ;;  %v1154_v10 = vadd.f32 %v1132_v5, %v978_v15  ;;  %v1683_v16 = vpop.eup %1682  ;;  %v1326_v3 = vld [vmem:[#allocation4 + $0x68] sm:$0xff]  ;;  %v968_v15 = vld [vmem:[#allocation4 + $0x78] sm:$0xff] }
 0x2fd   :  { %v1314_v53 = vld [vmem:[#allocation4 + $0x8] sm:$0xff]  ;;  %1172 = vst.msk [vmem:[#allocation4 + $0x50] sm:$0xff] %vm351_vm0, %v1155_v25  ;;  %v1685_v36 = vpop.eup %1684  ;;  %v976_v39 = vmul.f32 %v1683_v16, %v960_v17 }
 0x2fe   :  { %v1365_v33 = vadd.f32 %v1338_v56, %v1301_v41  ;;  %1686 = vlog2.f32 %v1314_v53  ;;  %1171 = vst.msk [vmem:[#allocation4 + $0x48] sm:$0xff] %vm351_vm0, %v1154_v10  ;;  %v975_v51 = vmul.f32 %v1685_v36, %v959_v32  ;;  %v1386_v56 = vld [vmem:[%s3141_s2 + $0x48] sm:$0xff] }
 0x2ff   :  { %1688 = vpow2.f32 %v927_v44 }
 0x300   :  { %v1397_v35 = vsub.f32 %v1365_v33, %v1381_v61  ;;  %1690 = vlog2.f32 %v1326_v3  ;;  %v1304_v3 = vld [vmem:[#allocation3 + $0x38] sm:$0xff] }
 0x301   :  { %v1267_v4 = vpop.xlane.xlu1 %1266  ;;  %1692 = vlog2.f32 %v1325_v58  ;;  %v1303_v58 = vld [vmem:[#allocation3 + $0x30] sm:$0xff] }
 0x302   :  { %1413 = vst.msk [vmem:[%s3141_s2 + $0x20] sm:$0xff] %vm351_vm0, %v1397_v35  ;;  %v1128_v42 = vpop.xlane.xlu0 %1127 }
 0x303   :  { %1288 = vst.msk [vmem:[%s3141_s2 + $0x50] sm:$0xff] %vm351_vm0, %v1267_v4  ;;  %v1152_v13 = vadd.f32 %v1128_v42, %v976_v39  ;;  %v1126_v11 = vpop.xlane.xlu2 %1125  ;;  %v1324_v33 = vld [vmem:[#allocation4 + $0x58] sm:$0xff] }
 0x304   :  { %v1687_v40 = vpop.eup %1686  ;;  %v1323_v8 = vld [vmem:[#allocation4 + $0x50] sm:$0xff]  ;;  %v1151_v14 = vadd.f32 %v1126_v11, %v975_v51  ;;  %v1384_v51 = vld [vmem:[%s3141_s2 + $0x38] sm:$0xff] }
 0x305   :  { %v1332_v9 = vmul.f32 0.6931472, %v1687_v40  ;;  %v1322_v48 = vld [vmem:[#allocation4 + $0x48] sm:$0xff]  ;;  %1694 = vlog2.f32 %v1323_v8  ;;  %1169 = vst.msk [vmem:[#allocation4 + $0x38] sm:$0xff] %vm351_vm0, %v1152_v13  ;;  %v1689_v57 = vpop.eup %1688  ;;  %v1383_v11 = vld [vmem:[%s3141_s2 + $0x30] sm:$0xff] }
 0x306   :  { %1696 = vlog2.f32 %v1322_v48  ;;  %1168 = vst.msk [vmem:[#allocation4 + $0x30] sm:$0xff] %vm351_vm0, %v1151_v14  ;;  %v1691_v23 = vpop.eup %1690  ;;  %v972_v59 = vmul.f32 %v1689_v57, %v956_v1  ;;  %v1327_v14 = vld [vmem:[#allocation4 + $0x70] sm:$0xff] }
 0x307   :  { %v1362_v24 = vadd.f32 %v1332_v9, %v1298_v38  ;;  %1698 = vpow2.f32 %v951_v45  ;;  %v1693_v47 = vpop.eup %1692  ;;  %v1356_v43 = vmul.f32 0.6931472, %v1691_v23  ;;  %v1300_v9 = vld [vmem:[#allocation3 + $0x18] sm:$0xff] }
 0x308   :  { %v1354_v31 = vmul.f32 0.6931472, %v1693_v47  ;;  %v1308_v23 = vld [vmem:[#allocation3 + $0x58] sm:$0xff] }
 0x309   :  { %v1273_v49 = vpop.xlane.xlu1 %1272  ;;  %v1394_v29 = vsub.f32 %v1362_v24, %v1378_v28  ;;  %v1374_v60 = vadd.f32 %v1356_v43, %v1310_v37  ;;  %v1380_v24 = vld [vmem:[%s3141_s2 + $0x18] sm:$0xff] }
 0x30a   :  { %1291 = vst.msk [vmem:[%s3141_s2 + $0x68] sm:$0xff] %vm351_vm0, %v1273_v49  ;;  %v1271_v26 = vpop.xlane.xlu0 %1270  ;;  %v1387_v18 = vld [vmem:[%s3141_s2 + $0x50] sm:$0xff]  ;;  %v1373_v21 = vadd.f32 %v1354_v31, %v1309_v52 }
 0x30b   :  { %v1695_v55 = vpop.eup %1694  ;;  %1410 = vst.msk [vmem:[%s3141_s2 + $0x8] sm:$0xff] %vm351_vm0, %v1394_v29  ;;  %v1120_v22 = vpop.xlane.xlu2 %1119 }
 0x30c   :  { %v1697_v0 = vpop.eup %1696  ;;  %v1350_v12 = vmul.f32 0.6931472, %v1695_v55  ;;  %v1320_v19 = vld [vmem:[#allocation4 + $0x38] sm:$0xff]  ;;  %1290 = vst.msk [vmem:[%s3141_s2 + $0x60] sm:$0xff] %vm351_vm0, %v1271_v26  ;;  %v1148_v62 = vadd.f32 %v1120_v22, %v972_v59 }
 0x30d   :  { %v1348_v6 = vmul.f32 0.6931472, %v1697_v0  ;;  %1700 = vlog2.f32 %v1320_v19  ;;  %v1319_v50 = vld [vmem:[#allocation4 + $0x30] sm:$0xff]  ;;  %v1699_v34 = vpop.eup %1698  ;;  %v1312_v22 = vld [vmem:[#allocation3 + $0x78] sm:$0xff] }
 0x30e   :  { %v1371_v46 = vadd.f32 %v1350_v12, %v1307_v2  ;;  %1702 = vlog2.f32 %v1319_v50  ;;  %1165 = vst.msk [vmem:[#allocation4 + $0x18] sm:$0xff] %vm351_vm0, %v1148_v62  ;;  %v984_v44 = vmul.f32 %v1699_v34, %v968_v15  ;;  %v1311_v19 = vld [vmem:[#allocation3 + $0x70] sm:$0xff] }
 0x30f   :  { %v1370_v63 = vadd.f32 %v1348_v6, %v1306_v54  ;;  %1704 = vlog2.f32 %v1324_v33 }
 0x310   :  { %v1403_v25 = vsub.f32 %v1371_v46, %v1387_v18 }
 0x311   :  { %v1390_v5 = vld [vmem:[%s3141_s2 + $0x68] sm:$0xff]  ;;  %v1402_v41 = vsub.f32 %v1370_v63, %v1386_v56 }
 0x312   :  { %v1406_v10 = vsub.f32 %v1374_v60, %v1390_v5  ;;  %1419 = vst.msk [vmem:[%s3141_s2 + $0x50] sm:$0xff] %vm351_vm0, %v1403_v25  ;;  %v1277_v27 = vpop.xlane.xlu0 %1276 }
 0x313   :  { %v1701_v53 = vpop.eup %1700  ;;  %1418 = vst.msk [vmem:[%s3141_s2 + $0x48] sm:$0xff] %vm351_vm0, %v1402_v41  ;;  %v1389_v16 = vld [vmem:[%s3141_s2 + $0x60] sm:$0xff]  ;;  %v1144_v61 = vpop.xlane.xlu2 %1143 }
 0x314   :  { %v1703_v17 = vpop.eup %1702  ;;  %v1344_v36 = vmul.f32 0.6931472, %v1701_v53  ;;  %1422 = vst.msk [vmem:[%s3141_s2 + $0x68] sm:$0xff] %vm351_vm0, %v1406_v10  ;;  %v1405_v35 = vsub.f32 %v1373_v21, %v1389_v16  ;;  %v1160_v32 = vadd.f32 %v1144_v61, %v984_v44 }
 0x315   :  { %v1342_v4 = vmul.f32 0.6931472, %v1703_v17  ;;  %v1316_v39 = vld [vmem:[#allocation4 + $0x18] sm:$0xff]  ;;  %1293 = vst.msk [vmem:[%s3141_s2 + $0x78] sm:$0xff] %vm351_vm0, %v1277_v27  ;;  %v1705_v20 = vpop.eup %1704 }
 0x316   :  { %v1368_v42 = vadd.f32 %v1344_v36, %v1304_v3  ;;  %1421 = vst.msk [vmem:[%s3141_s2 + $0x60] sm:$0xff] %vm351_vm0, %v1405_v35  ;;  %1706 = vlog2.f32 %v1316_v39  ;;  %v1352_v38 = vmul.f32 0.6931472, %v1705_v20 }
 0x317   :  { %v1367_v13 = vadd.f32 %v1342_v4, %v1303_v58  ;;  %1177 = vst.msk [vmem:[#allocation4 + $0x78] sm:$0xff] %vm351_vm0, %v1160_v32  ;;  %1708 = vlog2.f32 %v1327_v14 }
 0x318   :  { %v1400_v40 = vsub.f32 %v1368_v42, %v1384_v51  ;;  %v1372_v28 = vadd.f32 %v1352_v38, %v1308_v23 }
 0x319   :  { %v1399_v8 = vsub.f32 %v1367_v13, %v1383_v11 }
 0x31a   :  { %1416 = vst.msk [vmem:[%s3141_s2 + $0x38] sm:$0xff] %vm351_vm0, %v1400_v40 }
 0x31b   :  { %1415 = vst.msk [vmem:[%s3141_s2 + $0x30] sm:$0xff] %vm351_vm0, %v1399_v8  ;;  %v1269_v7 = vpop.xlane.xlu2 %1268 }
 0x31c   :  { %v1707_v30 = vpop.eup %1706  ;;  %1289 = vst.msk [vmem:[%s3141_s2 + $0x58] sm:$0xff] %vm351_vm0, %v1269_v7  ;;  %v1392_v12 = vld [vmem:[%s3141_s2 + $0x78] sm:$0xff] }
 0x31d   :  { %v1336_v45 = vmul.f32 0.6931472, %v1707_v30  ;;  %v1709_v49 = vpop.eup %1708 }
 0x31e   :  { %v1328_v48 = vld [vmem:[#allocation4 + $0x78] sm:$0xff]  ;;  %v1358_v43 = vmul.f32 0.6931472, %v1709_v49 }
 0x31f   :  { %v1364_v57 = vadd.f32 %v1336_v45, %v1300_v9  ;;  %1710 = vlog2.f32 %v1328_v48 }
 0x320   :  { %v1375_v6 = vadd.f32 %v1358_v43, %v1311_v19 }
 0x321   :  { %v1396_v1 = vsub.f32 %v1364_v57, %v1380_v24 }
 0x323   :  { %1412 = vst.msk [vmem:[%s3141_s2 + $0x18] sm:$0xff] %vm351_vm0, %v1396_v1  ;;  %v1388_v29 = vld [vmem:[%s3141_s2 + $0x58] sm:$0xff]  ;;  %v1275_v47 = vpop.xlane.xlu2 %1274 }
 0x324   :  { %v1404_v26 = vsub.f32 %v1372_v28, %v1388_v29  ;;  %1292 = vst.msk [vmem:[%s3141_s2 + $0x70] sm:$0xff] %vm351_vm0, %v1275_v47 }
 0x325   :  { %v1711_v59 = vpop.eup %1710 }
 0x326   :  { %v1360_v55 = vmul.f32 0.6931472, %v1711_v59  ;;  %1420 = vst.msk [vmem:[%s3141_s2 + $0x58] sm:$0xff] %vm351_vm0, %v1404_v26 }
 0x328   :  { %v1376_v0 = vadd.f32 %v1360_v55, %v1312_v22 }
 0x32a   :  { %v1408_v62 = vsub.f32 %v1376_v0, %v1392_v12 }
 0x32b   :  { %v1391_v2 = vld [vmem:[%s3141_s2 + $0x70] sm:$0xff] }
 0x32c   :  { %1424 = vst.msk [vmem:[%s3141_s2 + $0x78] sm:$0xff] %vm351_vm0, %v1408_v62  ;;  %v1407_v50 = vsub.f32 %v1375_v6, %v1391_v2 }
 0x32e   :  { %1423 = vst.msk [vmem:[%s3141_s2 + $0x70] sm:$0xff] %vm351_vm0, %v1407_v50 }
 0x32f   :  { %1429 = vsyncpa [#allocation6], 1 }
 0x330   :  { %1430 = vsyncpa [#allocation8], 1 }

</bundles_post_ra>
